<compile_context>
chip_gen: v7x
topology: tpu7x:2x2x1
jax: 0.10.0
libtpu: 0.0.40
codegen_flags: <defaults>
</compile_context>

<pallas_src>
import math
import functools

import jax
import jax.numpy as jnp
from jax.experimental import pallas as pl
from jax.experimental.pallas import tpu as pltpu

HIDDEN = 128
NUM_HEADS = 8
HEAD_DIM = HIDDEN // NUM_HEADS  # 16
SCALE = 1.0 / math.sqrt(HEAD_DIM)


def _attention_kernel(x_ref, wqkv_ref, bqkv_ref, wo_ref, bo_ref, o_ref, *, bt, seq_len):
    # ---- fused fat QKV projection: (Bt*S, 128) @ (128, 384), bf16 in / f32 acc ----
    x = x_ref[...].astype(jnp.bfloat16)            # (rows, H)
    wqkv = wqkv_ref[...].astype(jnp.bfloat16)      # (H, 3H)
    bqkv = bqkv_ref[...].astype(jnp.float32)       # (1, 3H), broadcasts over rows
    wo = wo_ref[...].astype(jnp.bfloat16)          # (H, H)
    bo = bo_ref[...].astype(jnp.float32)           # (1, H)

    qkv = jnp.dot(x, wqkv, preferred_element_type=jnp.float32) + bqkv   # (rows, 3H)

    # Lane-aligned 128-wide slices; fold the 1/sqrt(head_dim) scale into q.
    q = (qkv[:, 0:HIDDEN] * SCALE).astype(jnp.bfloat16)                 # (rows, H)
    k = qkv[:, HIDDEN:2 * HIDDEN].astype(jnp.bfloat16)
    v = qkv[:, 2 * HIDDEN:3 * HIDDEN].astype(jnp.bfloat16)

    # ---- per-batch-row attention; heads stay batched (leading dim of the einsums) ----
    ctx_parts = []
    for b in range(bt):                            # bt is small and static (<= 8)
        lo = b * seq_len
        qb = q[lo:lo + seq_len]                    # (S, H) static, sublane-aligned slice
        kb = k[lo:lo + seq_len]
        vb = v[lo:lo + seq_len]

        # (S, H) -> (heads, S, head_dim): minor-dim-preserving 3-D transpose.
        qh = qb.reshape(seq_len, NUM_HEADS, HEAD_DIM).transpose(1, 0, 2)
        kh = kb.reshape(seq_len, NUM_HEADS, HEAD_DIM).transpose(1, 0, 2)
        vh = vb.reshape(seq_len, NUM_HEADS, HEAD_DIM).transpose(1, 0, 2)

        # scores: (heads, S, S), f32 accumulation. (Scale already folded into q.)
        scores = jnp.einsum('hqd,hkd->hqk', qh, kh,
                            preferred_element_type=jnp.float32)

        # numerically stable softmax; reciprocal runs on the EUP (approx is plenty).
        m = jnp.max(scores, axis=-1, keepdims=True)
        e = jnp.exp(scores - m)
        denom = jnp.sum(e, axis=-1, keepdims=True)
        probs = (e * pl.reciprocal(denom, approx=True)).astype(jnp.bfloat16)

        # attn_dropout has p=0.0 -> identity.
        ctx_h = jnp.einsum('hqk,hkd->hqd', probs, vh,
                           preferred_element_type=jnp.float32)          # (heads, S, d)

        # merge heads back: (heads, S, d) -> (S, H); bf16 so the merge moves half bytes.
        ctx_parts.append(
            ctx_h.transpose(1, 0, 2).reshape(seq_len, HIDDEN).astype(jnp.bfloat16))

    ctx = ctx_parts[0] if bt == 1 else jnp.concatenate(ctx_parts, axis=0)  # (rows, H)

    # ---- fat output projection (proj_dropout p=0.0 -> identity) ----
    out = jnp.dot(ctx, wo, preferred_element_type=jnp.float32) + bo        # (rows, H)
    o_ref[...] = out.astype(o_ref.dtype)


def _choose_batch_tile(B, S):
    """Batch rows per grid step.

    Big enough to fill the MXU M dimension / amortize per-step pipeline overhead,
    small enough that the statically-unrolled per-row attention and the
    (heads, S, S) f32 score tensors stay comfortably inside scoped VMEM
    (16/32/32 MiB defaults on v5e/v6e/v7x; we raise the limit to 64 MiB anyway).
    """
    best = 1
    for bt in range(1, B + 1):
        if B % bt != 0:
            continue
        rows = bt * S
        if rows % 8 != 0 and bt != B:
            continue                      # keep the (rows, 128) block sublane-aligned
        if bt <= 8 and rows <= 512:
            best = bt
    return best


def attention_forward(hidden_states, params, vis=False):
    """Pallas equivalent of Attention.forward.

    hidden_states: (B, S, HIDDEN) float32
    params: dict with wq/bq/wk/bk/wv/bv/wo/bo; weights already (in, out).
    Returns (attention_output, weights) with weights=None (vis=False).
    """
    B, S, H = hidden_states.shape
    assert H == HIDDEN

    bt = _choose_batch_tile(B, S)
    rows = bt * S

    # Lane-dense 2-D view: blocks become plain (rows, 128) tiles.
    x2d = hidden_states.reshape(B * S, H)

    # Fuse the three projection weights into a single (H, 3H) matmul operand.
    wqkv = jnp.concatenate([params["wq"], params["wk"], params["wv"]], axis=1)
    bqkv = jnp.concatenate([params["bq"], params["bk"], params["bv"]], axis=1)

    kernel = functools.partial(_attention_kernel, bt=bt, seq_len=S)

    out2d = pl.pallas_call(
        kernel,
        out_shape=jax.ShapeDtypeStruct((B * S, H), hidden_states.dtype),
        grid_spec=pltpu.PrefetchScalarGridSpec(
            num_scalar_prefetch=0,
            grid=(B // bt,),
            in_specs=[
                pl.BlockSpec((rows, H), lambda i: (i, 0)),     # hidden_states block
                pl.BlockSpec((H, 3 * H), lambda i: (0, 0)),    # fused QKV weight
                pl.BlockSpec((1, 3 * H), lambda i: (0, 0)),    # fused QKV bias
                pl.BlockSpec((H, H), lambda i: (0, 0)),        # out weight
                pl.BlockSpec((1, H), lambda i: (0, 0)),        # out bias
            ],
            out_specs=pl.BlockSpec((rows, H), lambda i: (i, 0)),
        ),
        compiler_params=pltpu.CompilerParams(
            dimension_semantics=("parallel",),
            vmem_limit_bytes=64 * 1024 * 1024,
        ),
        # TODO(synk): when B is 1 (or odd/small) on v7x, add a second "parallel"
        # grid axis over query tiles so both TensorCores get work.
    )(x2d, wqkv, bqkv, params["wo"], params["bo"])

    out = out2d.reshape(B, S, H)
    weights = None  # vis=False; TODO(synk): also emit softmax probs when vis=True.
    return out, weights


def _reference_forward(x, params):
    """Pure-JAX f32 reference matching the PyTorch semantics."""
    B, S, H = x.shape
    q = x @ params["wq"] + params["bq"][0]
    k = x @ params["wk"] + params["bk"][0]
    v = x @ params["wv"] + params["bv"][0]

    def split(t):
        return t.reshape(B, S, NUM_HEADS, HEAD_DIM).transpose(0, 2, 1, 3)

    qh, kh, vh = split(q), split(k), split(v)
    scores = jnp.einsum('bhqd,bhkd->bhqk', qh, kh) / math.sqrt(HEAD_DIM)
    probs = jax.nn.softmax(scores, axis=-1)
    ctx = jnp.einsum('bhqk,bhkd->bhqd', probs, vh)
    ctx = ctx.transpose(0, 2, 1, 3).reshape(B, S, H)
    return ctx @ params["wo"] + params["bo"][0]


def init_params(key):
    keys = jax.random.split(key, 8)
    scale = 1.0 / math.sqrt(HIDDEN)

    def w(k):
        return jax.random.uniform(k, (HIDDEN, HIDDEN), jnp.float32,
                                  minval=-scale, maxval=scale)

    def b(k):
        return jax.random.uniform(k, (1, HIDDEN), jnp.float32,
                                  minval=-scale, maxval=scale)

    return {
        "wq": w(keys[0]), "bq": b(keys[1]),
        "wk": w(keys[2]), "bk": b(keys[3]),
        "wv": w(keys[4]), "bv": b(keys[5]),
        "wo": w(keys[6]), "bo": b(keys[7]),
    }


if __name__ == "__main__":
    key = jax.random.PRNGKey(0)
    k_x, k_p = jax.random.split(key)

    B, S = 2, 8
    hidden_states = jax.random.normal(k_x, (B, S, HIDDEN), jnp.float32)
    params = init_params(k_p)

    out, weights = attention_forward(hidden_states, params)
    out = jax.block_until_ready(out)

    ref = _reference_forward(hidden_states, params)
    assert out.shape == (B, S, HIDDEN)
    assert weights is None
    # bf16 matmul inputs (f32 accumulation) + approx reciprocal -> looser tolerance.
    assert jnp.allclose(out, ref, atol=3e-2, rtol=3e-2), "mismatch vs reference"

    print("KERNEL_OK")
</pallas_src>

<mosaic_0001>
module attributes {stable_mosaic.version = 11 : i64} {
  func.func @_attention_kernel(%arg0: i32, %arg1: memref<16x128xf32, #tpu.memory_space<vmem>>, %arg2: memref<128x384xf32, #tpu.memory_space<vmem>>, %arg3: memref<1x384xf32, #tpu.memory_space<vmem>>, %arg4: memref<128x128xf32, #tpu.memory_space<vmem>>, %arg5: memref<1x128xf32, #tpu.memory_space<vmem>>, %arg6: memref<16x128xf32, #tpu.memory_space<vmem>>) attributes {dimension_semantics = [#tpu.dimension_semantics<parallel>], iteration_bounds = array<i64: 1>, scalar_prefetch = 0 : i64, scratch_operands = 0 : i64, tpu.core_type = #tpu.core_type<tc>, window_params = [{transform_indices = @transform_0, window_bounds = array<i64: 16, 128>}, {pipeline_mode = #tpu.pipeline_mode<synchronous>, transform_indices = @transform_1, window_bounds = array<i64: 128, 384>}, {pipeline_mode = #tpu.pipeline_mode<synchronous>, transform_indices = @transform_2, window_bounds = array<i64: 1, 384>}, {pipeline_mode = #tpu.pipeline_mode<synchronous>, transform_indices = @transform_3, window_bounds = array<i64: 128, 128>}, {pipeline_mode = #tpu.pipeline_mode<synchronous>, transform_indices = @transform_4, window_bounds = array<i64: 1, 128>}, {transform_indices = @transform_5, window_bounds = array<i64: 16, 128>}]} {
    %c0 = arith.constant 0 : index
    %c0_0 = arith.constant 0 : index
    %0 = vector.load %arg1[%c0, %c0_0] : memref<16x128xf32, #tpu.memory_space<vmem>>, vector<16x128xf32>
    %1 = arith.truncf %0 : vector<16x128xf32> to vector<16x128xbf16>
    %c0_1 = arith.constant 0 : index
    %c0_2 = arith.constant 0 : index
    %2 = vector.load %arg2[%c0_1, %c0_2] : memref<128x384xf32, #tpu.memory_space<vmem>>, vector<128x384xf32>
    %3 = arith.truncf %2 : vector<128x384xf32> to vector<128x384xbf16>
    %c0_3 = arith.constant 0 : index
    %c0_4 = arith.constant 0 : index
    %4 = vector.load %arg3[%c0_3, %c0_4] : memref<1x384xf32, #tpu.memory_space<vmem>>, vector<1x384xf32>
    %c0_5 = arith.constant 0 : index
    %c0_6 = arith.constant 0 : index
    %5 = vector.load %arg4[%c0_5, %c0_6] : memref<128x128xf32, #tpu.memory_space<vmem>>, vector<128x128xf32>
    %6 = arith.truncf %5 : vector<128x128xf32> to vector<128x128xbf16>
    %c0_7 = arith.constant 0 : index
    %c0_8 = arith.constant 0 : index
    %7 = vector.load %arg5[%c0_7, %c0_8] : memref<1x128xf32, #tpu.memory_space<vmem>>, vector<1x128xf32>
    %cst = arith.constant dense<0.000000e+00> : vector<16x384xf32>
    %8 = tpu.matmul %1, %3, %cst {dimension_numbers = #tpu.dot_dimension_numbers<[1], [0], [0], [1], [0, 0, 1, 1], [], []>} : vector<16x128xbf16>, vector<128x384xbf16>, vector<16x384xf32> -> vector<16x384xf32>
    %9 = vector.broadcast %4 : vector<1x384xf32> to vector<16x384xf32>
    %10 = arith.addf %8, %9 : vector<16x384xf32>
    %11 = vector.extract_strided_slice %10 {offsets = [0, 0], sizes = [16, 128], strides = [1, 1]} : vector<16x384xf32> to vector<16x128xf32>
    %cst_9 = arith.constant 2.500000e-01 : f32
    %12 = vector.broadcast %cst_9 : f32 to vector<16x128xf32>
    %13 = arith.mulf %11, %12 : vector<16x128xf32>
    %14 = arith.truncf %13 : vector<16x128xf32> to vector<16x128xbf16>
    %15 = vector.extract_strided_slice %10 {offsets = [0, 128], sizes = [16, 128], strides = [1, 1]} : vector<16x384xf32> to vector<16x128xf32>
    %16 = arith.truncf %15 : vector<16x128xf32> to vector<16x128xbf16>
    %17 = vector.extract_strided_slice %10 {offsets = [0, 256], sizes = [16, 128], strides = [1, 1]} : vector<16x384xf32> to vector<16x128xf32>
    %18 = arith.truncf %17 : vector<16x128xf32> to vector<16x128xbf16>
    %19 = vector.extract_strided_slice %14 {offsets = [0, 0], sizes = [8, 128], strides = [1, 1]} : vector<16x128xbf16> to vector<8x128xbf16>
    %20 = vector.extract_strided_slice %16 {offsets = [0, 0], sizes = [8, 128], strides = [1, 1]} : vector<16x128xbf16> to vector<8x128xbf16>
    %21 = vector.extract_strided_slice %18 {offsets = [0, 0], sizes = [8, 128], strides = [1, 1]} : vector<16x128xbf16> to vector<8x128xbf16>
    %22 = vector.shape_cast %19 : vector<8x128xbf16> to vector<8x8x16xbf16>
    %23 = tpu.transpose %22, [1, 0, 2] : vector<8x8x16xbf16> -> vector<8x8x16xbf16>
    %24 = vector.shape_cast %20 : vector<8x128xbf16> to vector<8x8x16xbf16>
    %25 = tpu.transpose %24, [1, 0, 2] : vector<8x8x16xbf16> -> vector<8x8x16xbf16>
    %26 = vector.shape_cast %21 : vector<8x128xbf16> to vector<8x8x16xbf16>
    %27 = tpu.transpose %26, [1, 0, 2] : vector<8x8x16xbf16> -> vector<8x8x16xbf16>
    "tpu.trace_start"() <{level = 10 : i32, message = "hqd,hkd->hqk"}> : () -> ()
    %cst_10 = arith.constant dense<0.000000e+00> : vector<8x8x8xf32>
    %28 = tpu.matmul %23, %25, %cst_10 {dimension_numbers = #tpu.dot_dimension_numbers<[2], [2], [1], [1], [0, 0, 0, 1, 1, 1], [0], [0]>} : vector<8x8x16xbf16>, vector<8x8x16xbf16>, vector<8x8x8xf32> -> vector<8x8x8xf32>
    "tpu.trace_stop"() : () -> ()
    %cst_11 = arith.constant dense<0xFF800000> : vector<8x8xf32>
    %29 = vector.multi_reduction <maximumf>, %28, %cst_11 [2] : vector<8x8x8xf32> to vector<8x8xf32>
    %30 = vector.shape_cast %29 : vector<8x8xf32> to vector<8x8x1xf32>
    %31 = vector.broadcast %30 : vector<8x8x1xf32> to vector<8x8x8xf32>
    %32 = arith.subf %28, %31 : vector<8x8x8xf32>
    %33 = math.exp %32 : vector<8x8x8xf32>
    %cst_12 = arith.constant dense<0.000000e+00> : vector<8x8xf32>
    %34 = vector.multi_reduction <add>, %33, %cst_12 [2] : vector<8x8x8xf32> to vector<8x8xf32>
    %35 = vector.shape_cast %34 : vector<8x8xf32> to vector<8x8x1xf32>
    %36 = tpu.reciprocal %35 {approx = true} : vector<8x8x1xf32> -> vector<8x8x1xf32>
    %37 = vector.broadcast %36 : vector<8x8x1xf32> to vector<8x8x8xf32>
    %38 = arith.mulf %33, %37 : vector<8x8x8xf32>
    %39 = arith.truncf %38 : vector<8x8x8xf32> to vector<8x8x8xbf16>
    "tpu.trace_start"() <{level = 10 : i32, message = "hqk,hkd->hqd"}> : () -> ()
    %cst_13 = arith.constant dense<0.000000e+00> : vector<8x8x16xf32>
    %40 = tpu.matmul %39, %27, %cst_13 {dimension_numbers = #tpu.dot_dimension_numbers<[2], [1], [1], [2], [0, 0, 0, 1, 1, 2], [0], [0]>} : vector<8x8x8xbf16>, vector<8x8x16xbf16>, vector<8x8x16xf32> -> vector<8x8x16xf32>
    "tpu.trace_stop"() : () -> ()
    %41 = tpu.transpose %40, [1, 0, 2] : vector<8x8x16xf32> -> vector<8x8x16xf32>
    %42 = vector.shape_cast %41 : vector<8x8x16xf32> to vector<8x128xf32>
    %43 = arith.truncf %42 : vector<8x128xf32> to vector<8x128xbf16>
    %44 = vector.extract_strided_slice %14 {offsets = [8, 0], sizes = [8, 128], strides = [1, 1]} : vector<16x128xbf16> to vector<8x128xbf16>
    %45 = vector.extract_strided_slice %16 {offsets = [8, 0], sizes = [8, 128], strides = [1, 1]} : vector<16x128xbf16> to vector<8x128xbf16>
    %46 = vector.extract_strided_slice %18 {offsets = [8, 0], sizes = [8, 128], strides = [1, 1]} : vector<16x128xbf16> to vector<8x128xbf16>
    %47 = vector.shape_cast %44 : vector<8x128xbf16> to vector<8x8x16xbf16>
    %48 = tpu.transpose %47, [1, 0, 2] : vector<8x8x16xbf16> -> vector<8x8x16xbf16>
    %49 = vector.shape_cast %45 : vector<8x128xbf16> to vector<8x8x16xbf16>
    %50 = tpu.transpose %49, [1, 0, 2] : vector<8x8x16xbf16> -> vector<8x8x16xbf16>
    %51 = vector.shape_cast %46 : vector<8x128xbf16> to vector<8x8x16xbf16>
    %52 = tpu.transpose %51, [1, 0, 2] : vector<8x8x16xbf16> -> vector<8x8x16xbf16>
    "tpu.trace_start"() <{level = 10 : i32, message = "hqd,hkd->hqk"}> : () -> ()
    %cst_14 = arith.constant dense<0.000000e+00> : vector<8x8x8xf32>
    %53 = tpu.matmul %48, %50, %cst_14 {dimension_numbers = #tpu.dot_dimension_numbers<[2], [2], [1], [1], [0, 0, 0, 1, 1, 1], [0], [0]>} : vector<8x8x16xbf16>, vector<8x8x16xbf16>, vector<8x8x8xf32> -> vector<8x8x8xf32>
    "tpu.trace_stop"() : () -> ()
    %cst_15 = arith.constant dense<0xFF800000> : vector<8x8xf32>
    %54 = vector.multi_reduction <maximumf>, %53, %cst_15 [2] : vector<8x8x8xf32> to vector<8x8xf32>
    %55 = vector.shape_cast %54 : vector<8x8xf32> to vector<8x8x1xf32>
    %56 = vector.broadcast %55 : vector<8x8x1xf32> to vector<8x8x8xf32>
    %57 = arith.subf %53, %56 : vector<8x8x8xf32>
    %58 = math.exp %57 : vector<8x8x8xf32>
    %cst_16 = arith.constant dense<0.000000e+00> : vector<8x8xf32>
    %59 = vector.multi_reduction <add>, %58, %cst_16 [2] : vector<8x8x8xf32> to vector<8x8xf32>
    %60 = vector.shape_cast %59 : vector<8x8xf32> to vector<8x8x1xf32>
    %61 = tpu.reciprocal %60 {approx = true} : vector<8x8x1xf32> -> vector<8x8x1xf32>
    %62 = vector.broadcast %61 : vector<8x8x1xf32> to vector<8x8x8xf32>
    %63 = arith.mulf %58, %62 : vector<8x8x8xf32>
    %64 = arith.truncf %63 : vector<8x8x8xf32> to vector<8x8x8xbf16>
    "tpu.trace_start"() <{level = 10 : i32, message = "hqk,hkd->hqd"}> : () -> ()
    %cst_17 = arith.constant dense<0.000000e+00> : vector<8x8x16xf32>
    %65 = tpu.matmul %64, %52, %cst_17 {dimension_numbers = #tpu.dot_dimension_numbers<[2], [1], [1], [2], [0, 0, 0, 1, 1, 2], [0], [0]>} : vector<8x8x8xbf16>, vector<8x8x16xbf16>, vector<8x8x16xf32> -> vector<8x8x16xf32>
    "tpu.trace_stop"() : () -> ()
    %66 = tpu.transpose %65, [1, 0, 2] : vector<8x8x16xf32> -> vector<8x8x16xf32>
    %67 = vector.shape_cast %66 : vector<8x8x16xf32> to vector<8x128xf32>
    %68 = arith.truncf %67 : vector<8x128xf32> to vector<8x128xbf16>
    %69 = tpu.concatenate %43, %68 in 0 : vector<8x128xbf16>, vector<8x128xbf16> -> vector<16x128xbf16>
    %cst_18 = arith.constant dense<0.000000e+00> : vector<16x128xf32>
    %70 = tpu.matmul %69, %6, %cst_18 {dimension_numbers = #tpu.dot_dimension_numbers<[1], [0], [0], [1], [0, 0, 1, 1], [], []>} : vector<16x128xbf16>, vector<128x128xbf16>, vector<16x128xf32> -> vector<16x128xf32>
    %71 = vector.broadcast %7 : vector<1x128xf32> to vector<16x128xf32>
    %72 = arith.addf %70, %71 : vector<16x128xf32>
    %c0_19 = arith.constant 0 : index
    %c0_20 = arith.constant 0 : index
    %73 = vector.load %arg6[%c0_19, %c0_20] : memref<16x128xf32, #tpu.memory_space<vmem>>, vector<16x128xf32>
    tpu.vector_store %arg6[%c0_19, %c0_20], %72 {strides = array<i32>} : memref<16x128xf32, #tpu.memory_space<vmem>>, vector<16x128xf32>,
    return
  }
  func.func @transform_0(%arg0: i32) -> (i32, i32) {
    %c0_i32 = arith.constant 0 : i32
    %c0_i32_0 = arith.constant 0 : i32
    return %arg0, %c0_i32 : i32, i32
  }
  func.func @transform_1(%arg0: i32) -> (i32, i32) {
    %c0_i32 = arith.constant 0 : i32
    %c0_i32_0 = arith.constant 0 : i32
    %c0_i32_1 = arith.constant 0 : i32
    return %c0_i32, %c0_i32_0 : i32, i32
  }
  func.func @transform_2(%arg0: i32) -> (i32, i32) {
    %c0_i32 = arith.constant 0 : i32
    %c0_i32_0 = arith.constant 0 : i32
    %c0_i32_1 = arith.constant 0 : i32
    return %c0_i32, %c0_i32_0 : i32, i32
  }
  func.func @transform_3(%arg0: i32) -> (i32, i32) {
    %c0_i32 = arith.constant 0 : i32
    %c0_i32_0 = arith.constant 0 : i32
    %c0_i32_1 = arith.constant 0 : i32
    return %c0_i32, %c0_i32_0 : i32, i32
  }
  func.func @transform_4(%arg0: i32) -> (i32, i32) {
    %c0_i32 = arith.constant 0 : i32
    %c0_i32_0 = arith.constant 0 : i32
    %c0_i32_1 = arith.constant 0 : i32
    return %c0_i32, %c0_i32_0 : i32, i32
  }
  func.func @transform_5(%arg0: i32) -> (i32, i32) {
    %c0_i32 = arith.constant 0 : i32
    %c0_i32_0 = arith.constant 0 : i32
    return %arg0, %c0_i32 : i32, i32
  }
}

</mosaic_0001>

<bundles_post_ra>
// kernel: tpu_custom_call.1
= control target key start
LH: loop header
LB: loop body
LE: loop exit
PB: predicated region body
PF: predicated region fallthrough
CT: control target
= control target key end

     0   :  { %10 = vsyncpa [#allocation3], 0  ;;  %s5731_s0 = inlined_call_operand.hbm [shape: f32[16,128], index: 0, kind: input, shape index: {}]   ;;  %s5732_s1 = inlined_call_operand.hbm [shape: f32[128,384], index: 1, kind: input, shape index: {}]   ;;  %s5733_s2 = inlined_call_operand.hbm [shape: f32[1,384], index: 2, kind: input, shape index: {}]   ;;  %s5734_s3 = inlined_call_operand.hbm [shape: f32[128,128], index: 3, kind: input, shape index: {}]   ;;  %s5735_s4 = inlined_call_operand.hbm [shape: f32[1,128], index: 4, kind: input, shape index: {}]   ;;  %s5736_s5 = inlined_call_operand.hbm [shape: f32[16,128], index: 5, kind: output, shape index: {}]  }
   0x1   :  { %11 = vsyncpa [#allocation6], 0 }
   0x2   :  { %12 = vsyncpa [#allocation9], 0 }
   0x3   :  { %13 = vsyncpa [#allocation4], 0  ;;  %s4540_s18 = smov [#allocation5]   ;;  %s4400_s22 = scalar_lea.hbm %s5732_s1, 6144 }
   0x4   :  { %s31_s19 = sshll.u32 %s4540_s18, 4  ;;  %p4401_p0 = scmp.ne.s32.totalorder %s5732_s1, %s4400_s22  ;;  %s32_s19 = int_to_ptr.vmem [resolvable:$true] %s31_s19 }
   0x5   :  { %p4404_p1 = scmp.lt.u32.totalorder %s4400_s22, %s5732_s1 }
   0x7   :  { %p4406_p2 = pnand %p4404_p1, %p4401_p0 }
   0x9   :  { %4409 = shalt.err (!%p4406_p2)
}
   0xa   :  { %s4410_s27 = scalar_lea.vmem %s32_s19, 6144  ;;  %p4415_p4 = scmp.lt.s32.totalorder %s32_s19, %s32_s19 }
   0xb   :  { %p4411_p3 = scmp.ne.s32.totalorder %s32_s19, %s4410_s27  ;;  %p4416_p5 = scmp.lt.s32.totalorder %s4410_s27, %s4410_s27 }
   0xd   :  { %p4417_p6 = por %p4416_p5, %p4415_p4 }
   0xf   :  { %p4418_p7 = pnand %p4417_p6, %p4411_p3 }
  0x11   :  { %4421 = shalt.err (!%p4418_p7)
}
  0x12   :  { %s4541_s28 = smov 384   ;;  %s4542_s29 = smov 24  }
  0x13   :  { %37 = dma.hbm_to_vmem [thread:$0]  %s5732_s1, 6144, %s32_s19, [#allocation6], %s4541_s28, %s4541_s28, %s4542_s29  }
  0x14   :  { %s4543_s7 = smov [#allocation8]   ;;  %s4544_s9 = smov [#allocation2]  }
  0x15   :  { %s53_s8 = sshll.u32 %s4543_s7, 4  ;;  %s19_s10 = sshll.u32 %s4544_s9, 4  ;;  %s54_s8 = int_to_ptr.vmem [resolvable:$true] %s53_s8  ;;  %s20_s10 = int_to_ptr.vmem [resolvable:$true] %s19_s10 }
  0x16   :  { %s4422_s13 = scalar_lea.hbm %s5734_s3, 2048 }
  0x17   :  { %p4423_p8 = scmp.ne.s32.totalorder %s5734_s3, %s4422_s13  ;;  %p4426_p9 = scmp.lt.u32.totalorder %s4422_s13, %s5734_s3 }
  0x19   :  { %p4428_p10 = pnand %p4426_p9, %p4423_p8 }
  0x1b   :  { %4431 = shalt.err (!%p4428_p10)
}
  0x1c   :  { %s4432_s1 = scalar_lea.vmem %s54_s8, 2048  ;;  %p4437_p12 = scmp.lt.s32.totalorder %s54_s8, %s54_s8 }
  0x1d   :  { %p4433_p11 = scmp.ne.s32.totalorder %s54_s8, %s4432_s1  ;;  %p4438_p13 = scmp.lt.s32.totalorder %s4432_s1, %s4432_s1 }
  0x1f   :  { %p4439_p0 = por %p4438_p13, %p4437_p12 }
  0x21   :  { %p4440_p1 = pnand %p4439_p0, %p4433_p11 }
  0x23   :  { %4443 = shalt.err (!%p4440_p1)
}
  0x24   :  { %s4545_s18 = smov 128   ;;  %s4546_s19 = smov 8  }
  0x25   :  { %59 = dma.hbm_to_vmem [thread:$0]  %s5734_s3, 2048, %s54_s8, [#allocation9], %s4545_s18, %s4545_s18, %s4546_s19  }
  0x26   :  { %s4444_s24 = scalar_lea.hbm %s5731_s0, 256 }
  0x27   :  { %p4445_p2 = scmp.ne.s32.totalorder %s5731_s0, %s4444_s24  ;;  %p4448_p3 = scmp.lt.u32.totalorder %s4444_s24, %s5731_s0 }
  0x29   :  { %p4450_p4 = pnand %p4448_p3, %p4445_p2 }
  0x2b   :  { %4453 = shalt.err (!%p4450_p4)
}
  0x2c   :  { %s4454_s29 = scalar_lea.vmem %s20_s10, 256  ;;  %p4459_p6 = scmp.lt.s32.totalorder %s20_s10, %s20_s10 }
  0x2d   :  { %p4455_p5 = scmp.ne.s32.totalorder %s20_s10, %s4454_s29  ;;  %p4460_p7 = scmp.lt.s32.totalorder %s4454_s29, %s4454_s29 }
  0x2f   :  { %p4461_p8 = por %p4460_p7, %p4459_p6 }
  0x31   :  { %p4462_p9 = pnand %p4461_p8, %p4455_p5 }
  0x33   :  { %4465 = shalt.err (!%p4462_p9)
}
  0x34   :  { %25 = dma.hbm_to_vmem [thread:$0]  %s5731_s0, 256, %s20_s10, [#allocation3], %s4545_s18, %s4545_s18, %s4546_s19  }
  0x35   :  { %s4547_s6 = smov [#allocation7]   ;;  %s4548_s8 = smov [#allocation10]  }
  0x36   :  { %s44_s7 = sshll.u32 %s4547_s6, 4  ;;  %s66_s9 = sshll.u32 %s4548_s8, 4  ;;  %s45_s7 = int_to_ptr.vmem [resolvable:$true] %s44_s7  ;;  %s67_s9 = int_to_ptr.vmem [resolvable:$true] %s66_s9 }
  0x37   :  { %s4466_s13 = scalar_lea.hbm %s5733_s2, 48 }
  0x38   :  { %p4467_p10 = scmp.ne.s32.totalorder %s5733_s2, %s4466_s13  ;;  %p4470_p11 = scmp.lt.u32.totalorder %s4466_s13, %s5733_s2 }
  0x3a   :  { %p4472_p12 = pnand %p4470_p11, %p4467_p10 }
  0x3c   :  { %4475 = shalt.err (!%p4472_p12)
}
  0x3d   :  { %s4476_s0 = scalar_lea.vmem %s45_s7, 48  ;;  %s4480_s10 = scalar_lea.vmem %s45_s7, 64 }
  0x3e   :  { %p4477_p13 = scmp.ne.s32.totalorder %s45_s7, %s4476_s0  ;;  %p4481_p0 = scmp.lt.s32.totalorder %s45_s7, %s45_s7 }
  0x3f   :  { %p4482_p1 = scmp.lt.s32.totalorder %s4480_s10, %s4476_s0 }
  0x41   :  { %p4483_p2 = por %p4482_p1, %p4481_p0 }
  0x43   :  { %p4484_p3 = pnand %p4483_p2, %p4477_p13 }
  0x45   :  { %4487 = shalt.err (!%p4484_p3)
}
  0x46   :  { %47 = dma.hbm_to_vmem [thread:$0]  %s5733_s2, 48, %s45_s7, [#allocation6]  }
  0x47   :  { %s4488_s23 = scalar_lea.hbm %s5735_s4, 16 }
  0x48   :  { %p4489_p4 = scmp.ne.s32.totalorder %s5735_s4, %s4488_s23  ;;  %p4492_p5 = scmp.lt.u32.totalorder %s4488_s23, %s5735_s4 }
  0x4a   :  { %p4494_p6 = pnand %p4492_p5, %p4489_p4 }
  0x4c   :  { %4497 = shalt.err (!%p4494_p6)
}
  0x4d   :  { %s4498_s28 = scalar_lea.vmem %s67_s9, 16  ;;  %s4502_s29 = scalar_lea.vmem %s67_s9, 32 }
  0x4e   :  { %p4499_p7 = scmp.ne.s32.totalorder %s67_s9, %s4498_s28  ;;  %p4503_p8 = scmp.lt.s32.totalorder %s67_s9, %s67_s9 }
  0x4f   :  { %p4504_p9 = scmp.lt.s32.totalorder %s4502_s29, %s4498_s28 }
  0x51   :  { %p4505_p10 = por %p4504_p9, %p4503_p8 }
  0x53   :  { %p4506_p11 = pnand %p4505_p10, %p4499_p7 }
  0x55   :  { %4509 = shalt.err (!%p4506_p11)
}
  0x56   :  { %69 = dma.hbm_to_vmem [thread:$0]  %s5735_s4, 16, %s67_s9, [#allocation9]  }
  0x57   :  { %4532 = dma.done.wait [#allocation3], 256  }
  0x58   :  { %4533 = vsyncadd [#allocation3], 4294967040 }
  0x59   :  { %4534 = dma.done.wait [#allocation6], 6192  }
  0x5a   :  { %4535 = vsyncadd [#allocation6], 4294961104 }
  0x5b   :  { %4536 = dma.done.wait [#allocation9], 2064  }
  0x5c   :  { %4537 = vsyncadd [#allocation9], 4294965232  ;;  %v4549_v0 = vmov 0   ;;  %v90_v1 = vld [vmem:[#allocation5 + $0x8] sm:$0xff]  ;;  %v93_v2 = vld [vmem:[#allocation5 + $0x20] sm:$0xff]  ;;  %v5737_v52 = vmov 0.0   ;;  %v188_v53 = vlaneseq }
  0x5d   :  { %235 = vmatprep.mubr.bf16.mxu0 %v4549_v0  ;;  %v89_v3 = vld [vmem:[#allocation5] sm:$0xff]  ;;  %v138_v4 = vpack.c.bf16 %v93_v2, %v90_v1  ;;  %v92_v5 = vld [vmem:[#allocation5 + $0x18] sm:$0xff]  ;;  %v99_v7 = vld [vmem:[#allocation5 + $0x50] sm:$0xff]  ;;  %4052 = vmatprep.subr.bf16.mxu1 %v5737_v52  ;;  %s4551_s4 = smov 80   ;;  %s4552_s30 = smov 112   ;;  %vm4558_vm0 = vmmov 0  }
  0x5e   :  { %v96_v6 = vld [vmem:[#allocation5 + $0x38] sm:$0xff]  ;;  %v137_v8 = vpack.c.bf16 %v92_v5, %v89_v3  ;;  %v95_v10 = vld [vmem:[#allocation5 + $0x30] sm:$0xff]  ;;  %v98_v11 = vld [vmem:[#allocation5 + $0x48] sm:$0xff]  ;;  %v4664_v54 = vshrl.u32 %v188_v53, 7  ;;  %s4553_s6 = smov 64   ;;  %s4554_s7 = smov 96   ;;  %4068 = vmatprep.mubr.msk.bf16.mxu1 %vm4558_vm0, %v5737_v52 }
  0x5f   :  { %v141_v9 = vpack.c.bf16 %v99_v7, %v96_v6  ;;  %v102_v12 = vld [vmem:[#allocation5 + $0x68] sm:$0xff]  ;;  %203 = vmatprep.subr.bf16.mxu0 %v138_v4  ;;  %v105_v13 = vld [vmem:[#allocation5 + $0x80] sm:$0xff]  ;;  %v140_v14 = vpack.c.bf16 %v98_v11, %v95_v10  ;;  %v104_v17 = vld [vmem:[#allocation5 + $0x78] sm:$0xff]  ;;  %s4555_s8 = smov 32   ;;  %s4556_s9 = smov 48   ;;  %vm934_vm1 = vcmask 130048  }
  0x60   :  { %204 = vmatpush1.bf16.msra.mxu0 %v137_v8  ;;  %v144_v15 = vpack.c.bf16 %v105_v13, %v102_v12  ;;  %v101_v16 = vld [vmem:[#allocation5 + $0x60] sm:$0xff]  ;;  %v108_v18 = vld [vmem:[#allocation5 + $0x98] sm:$0xff]  ;;  %v111_v19 = vld [vmem:[#allocation5 + $0xb0] sm:$0xff]  ;;  %v190_v57 = vsub.s32 0, %v4664_v54  ;;  %v194_v60 = vsub.s32 1, %v4664_v54  ;;  %s4557_s11 = smov 16  }
  0x61   :  { %205 = vmatprep.subr.bf16.mxu0 %v141_v9  ;;  %v143_v20 = vpack.c.bf16 %v104_v17, %v101_v16  ;;  %v147_v21 = vpack.c.bf16 %v111_v19, %v108_v18  ;;  %v107_v22 = vld [vmem:[#allocation5 + $0x90] sm:$0xff]  ;;  %v110_v23 = vld [vmem:[#allocation5 + $0xa8] sm:$0xff]  ;;  %v117_v25 = vld [vmem:[#allocation5 + $0xe0] sm:$0xff]  ;;  %vm1303_vm2 = vcmask 64512   ;;  %vm1403_vm3 = vcmask 1043456   ;;  %s4561_s12 = smov [#allocation11]  }
  0x62   :  { %v114_v24 = vld [vmem:[#allocation5 + $0xc8] sm:$0xff]  ;;  %v146_v26 = vpack.c.bf16 %v110_v23, %v107_v22  ;;  %v113_v28 = vld [vmem:[#allocation5 + $0xc0] sm:$0xff]  ;;  %v116_v29 = vld [vmem:[#allocation5 + $0xd8] sm:$0xff]  ;;  %vm2070_vm4 = vcmask 261120   ;;  %vm2072_vm5 = vcmask 392192   ;;  %vm2074_vm6 = vcmask 523264  }
  0x63   :  { %v150_v27 = vpack.c.bf16 %v117_v25, %v114_v24  ;;  %v120_v30 = vld [vmem:[#allocation5 + $0xf8] sm:$0xff]  ;;  %v123_v31 = vld [vmem:[#allocation5 + $0x110] sm:$0xff]  ;;  %v149_v32 = vpack.c.bf16 %v116_v29, %v113_v28  ;;  %v122_v35 = vld [vmem:[#allocation5 + $0x108] sm:$0xff]  ;;  %vm2076_vm7 = vcmask 654336   ;;  %vm2078_vm8 = vcmask 785408   ;;  %s3907_s13 = sshll.u32 %s4561_s12, 4  ;;  %s3908_s13 = int_to_ptr.vmem [resolvable:$true] %s3907_s13 }
  0x64   :  { %206 = vmatpush1.bf16.msra.mxu0 %v140_v14  ;;  %v153_v33 = vpack.c.bf16 %v123_v31, %v120_v30  ;;  %v119_v34 = vld [vmem:[#allocation5 + $0xf0] sm:$0xff]  ;;  %v126_v36 = vld [vmem:[#allocation5 + $0x128] sm:$0xff]  ;;  %v129_v37 = vld [vmem:[#allocation5 + $0x140] sm:$0xff]  ;;  %vm2080_vm9 = vcmask 916480   ;;  %s4510_s14 = scalar_lea.vmem %s3908_s13, 256  ;;  %p4515_p13 = scmp.lt.s32.totalorder %s3908_s13, %s3908_s13 }
  0x65   :  { %207 = vmatprep.subr.bf16.mxu0 %v144_v15  ;;  %v152_v38 = vpack.c.bf16 %v122_v35, %v119_v34  ;;  %v156_v39 = vpack.c.bf16 %v129_v37, %v126_v36  ;;  %v125_v40 = vld [vmem:[#allocation5 + $0x120] sm:$0xff]  ;;  %v128_v41 = vld [vmem:[#allocation5 + $0x138] sm:$0xff]  ;;  %v135_v43 = vld [vmem:[#allocation5 + $0x170] sm:$0xff]  ;;  %p4511_p12 = scmp.ne.s32.totalorder %s3908_s13, %s4510_s14  ;;  %p4516_p0 = scmp.lt.s32.totalorder %s4510_s14, %s4510_s14 }
  0x66   :  { %v132_v42 = vld [vmem:[#allocation5 + $0x158] sm:$0xff]  ;;  %v155_v44 = vpack.c.bf16 %v128_v41, %v125_v40  ;;  %v131_v46 = vld [vmem:[#allocation5 + $0x150] sm:$0xff]  ;;  %v134_v47 = vld [vmem:[#allocation5 + $0x168] sm:$0xff] }
  0x67   :  { %v159_v45 = vpack.c.bf16 %v135_v43, %v132_v42  ;;  %v158_v48 = vpack.c.bf16 %v134_v47, %v131_v46  ;;  %v86_v49 = vld [vmem:[#allocation2] sm:$0xff]  ;;  %v87_v50 = vld [vmem:[#allocation2 + $0x8] sm:$0xff]  ;;  %v94_v56 = vld [vmem:[#allocation5 + $0x28] sm:$0xff]  ;;  %p4517_p1 = por %p4516_p0, %p4515_p13 }
  0x68   :  { %208 = vmatpush1.bf16.msra.mxu0 %v143_v20  ;;  %v4659_v51 = vpack.c.bf16 %v87_v50, %v86_v49  ;;  %v91_v55 = vld [vmem:[#allocation5 + $0x10] sm:$0xff]  ;;  %v4667_v59 = vld [vmem:[#allocation7] sm:$0x7]  ;;  %v100_v62 = vld [vmem:[#allocation5 + $0x58] sm:$0xff] }
  0x69   :  { %209 = vmatprep.subr.bf16.mxu0 %v147_v21  ;;  %v139_v58 = vpack.c.bf16 %v94_v56, %v91_v55  ;;  %v97_v61 = vld [vmem:[#allocation5 + $0x40] sm:$0xff]  ;;  %v191_v63 = vrot.slane %v4667_v59, %v190_v57  ;;  %v195_v3 = vrot.slane %v4667_v59, %v194_v60  ;;  %v103_v6 = vld [vmem:[#allocation5 + $0x70] sm:$0xff]  ;;  %v106_v7 = vld [vmem:[#allocation5 + $0x88] sm:$0xff]  ;;  %p4518_p2 = pnand %p4517_p1, %p4511_p12 }
  0x6a   :  { %v142_v1 = vpack.c.bf16 %v100_v62, %v97_v61  ;;  %v145_v9 = vpack.c.bf16 %v106_v7, %v103_v6  ;;  %v109_v18 = vld [vmem:[#allocation5 + $0xa0] sm:$0xff]  ;;  %v112_v19 = vld [vmem:[#allocation5 + $0xb8] sm:$0xff]  ;;  %v115_v21 = vld [vmem:[#allocation5 + $0xd0] sm:$0xff] }
  0x6b   :  { %4053 = vmatpush3.bf16.msra.mxu1 %v139_v58  ;;  %v148_v20 = vpack.c.bf16 %v112_v19, %v109_v18  ;;  %v118_v22 = vld [vmem:[#allocation5 + $0xe8] sm:$0xff]  ;;  %v121_v24 = vld [vmem:[#allocation5 + $0x100] sm:$0xff]  ;;  %v124_v25 = vld [vmem:[#allocation5 + $0x118] sm:$0xff] }
  0x6c   :  { %210 = vmatpush1.bf16.msra.mxu0 %v146_v26  ;;  %4054 = vmatprep.subr.bf16.mxu1 %v5737_v52  ;;  %v151_v23 = vpack.c.bf16 %v118_v22, %v115_v21  ;;  %v154_v26 = vpack.c.bf16 %v124_v25, %v121_v24  ;;  %v130_v28 = vld [vmem:[#allocation5 + $0x148] sm:$0xff]  ;;  %v133_v30 = vld [vmem:[#allocation5 + $0x160] sm:$0xff]  ;;  %v136_v31 = vld [vmem:[#allocation5 + $0x178] sm:$0xff] }
  0x6d   :  { %211 = vmatprep.subr.bf16.mxu0 %v150_v27  ;;  %v127_v27 = vld [vmem:[#allocation5 + $0x130] sm:$0xff] }
  0x6e   :  { %v157_v29 = vpack.c.bf16 %v130_v28, %v127_v27 }
  0x6f   :  { %4055 = vmatpush3.bf16.msra.mxu1 %v142_v1 }
  0x70   :  { %212 = vmatpush1.bf16.msra.mxu0 %v149_v32  ;;  %4056 = vmatprep.subr.bf16.mxu1 %v5737_v52  ;;  %v160_v32 = vpack.c.bf16 %v136_v31, %v133_v30 }
  0x71   :  { %213 = vmatprep.subr.bf16.mxu0 %v153_v33  ;;  %v4559_v33 = vmov 1983009808  }
  0x72   :  { %v316_v34 = vunpack.c.l.s4 %v4559_v33 }
  0x73   :  { %4057 = vmatpush3.bf16.msra.mxu1 %v145_v9 }
  0x74   :  { %214 = vmatpush1.bf16.msra.mxu0 %v152_v38  ;;  %4058 = vmatprep.subr.bf16.mxu1 %v5737_v52  ;;  %v317_v37 = vunpack.c.0.s8 %v316_v34  ;;  %v4560_v38 = vmov 1934713408  }
  0x75   :  { %215 = vmatprep.subr.bf16.mxu0 %v156_v39  ;;  %v333_v39 = vunpack.c.l.s4 %v4560_v38 }
  0x77   :  { %4059 = vmatpush3.bf16.msra.mxu1 %v148_v20 }
  0x78   :  { %216 = vmatpush1.bf16.msra.mxu0 %v155_v44  ;;  %4060 = vmatprep.subr.bf16.mxu1 %v5737_v52  ;;  %v4721_v44 = vsub.s32 %v317_v37, %v4664_v54 }
  0x79   :  { %217 = vmatprep.subr.bf16.mxu0 %v159_v45  ;;  %v334_v45 = vunpack.c.0.s8 %v333_v39 }
  0x7b   :  { %4061 = vmatpush3.bf16.msra.mxu1 %v151_v23  ;;  %v4725_v57 = vsub.s32 %v334_v45, %v4664_v54 }
  0x7c   :  { %218 = vmatpush1.bf16.msra.mxu0 %v158_v48  ;;  %4062 = vmatprep.subr.bf16.mxu1 %v5737_v52 }
  0x7d   :  { %4096 = vmatprep.subr.bf16.mxu0 %v5737_v52 }
  0x7f   :  { %236 = vmatmul.mubr.bf16.vlgmr.msra.gmra.mrb[0].mxu0 %v4659_v51  ;;  %4063 = vmatpush3.bf16.msra.mxu1 %v154_v26 }
  0x80   :  { %4064 = vmatprep.subr.bf16.mxu1 %v5737_v52  ;;  %4098 = vmatprep.mubr.msk.bf16.mxu0 %vm4558_vm0, %v5737_v52 }
  0x83   :  { %4065 = vmatpush3.bf16.msra.mxu1 %v157_v29 }
  0x84   :  { %4066 = vmatprep.subr.bf16.mxu1 %v5737_v52 }
  0x87   :  { %4067 = vmatpush3.bf16.msra.mxu1 %v160_v32 }
  0x88   :  { %4072 = vmatprep.subr.bf16.mxu1 %v5737_v52 }
  0x8a   :  { %4069 = vmatmul.mubr.bf16.vlgmr.msra.gmra.mrb[0].mxu1 %v4659_v51 }
  0x8b   :  { %4074 = vmatprep.mubr.msk.bf16.mxu1 %vm4558_vm0, %v5737_v52 }
 0x152   :  { %v237_v2 = vpop.f32.mrb[0].mxu0 }
 0x153   :  { %v238_v4 = vadd.f32 %v237_v2, %v191_v63  ;;  %v239_v5 = vpop.f32.mrb[1].mxu0 }
 0x154   :  { %v241_v8 = vpop.f32.mrb[2].mxu0  ;;  %v240_v12 = vadd.f32 %v239_v5, %v195_v3 }
 0x155   :  { %v242_v10 = vadd.f32 %v241_v8, %v191_v63  ;;  %v243_v11 = vpop.f32.mrb[3].mxu0  ;;  %v287_v14 = vmul.f32 0.25, %v238_v4 }
 0x156   :  { %v244_v13 = vadd.f32 %v243_v11, %v195_v3 }
 0x157   :  { %v288_v15 = vmul.f32 0.25, %v242_v10 }
 0x158   :  { %v4675_v16 = vpack.c.bf16 %v244_v13, %v240_v12 }
 0x159   :  { %v4677_v17 = vpack.c.bf16 %v288_v15, %v287_v14 }
 0x15a   :  { %513 = vrot.lane.b32.xlu1 %v4675_v16, %s4551_s4  ;;  %507 = vrot.lane.b32.xlu0 %v4675_v16, %s4552_s30  ;;  %v2291_v43 = vrot.slane %v4675_v16, 4 }
 0x15e   :  { %516 = vrot.lane.b32.xlu1 %v4675_v16, %s4553_s6  ;;  %510 = vrot.lane.b32.xlu0 %v4675_v16, %s4554_s7 }
 0x162   :  { %522 = vrot.lane.b32.xlu1 %v4675_v16, %s4555_s8  ;;  %519 = vrot.lane.b32.xlu0 %v4675_v16, %s4556_s9 }
 0x166   :  { %525 = vrot.lane.b32.xlu0 %v4675_v16, %s4557_s11  ;;  %293 = vrot.lane.b32.xlu1 %v4677_v17, %s4552_s30 }
 0x16a   :  { %296 = vrot.lane.b32.xlu0 %v4677_v17, %s4554_s7  ;;  %299 = vrot.lane.b32.xlu1 %v4677_v17, %s4551_s4 }
 0x16e   :  { %302 = vrot.lane.b32.xlu0 %v4677_v17, %s4553_s6  ;;  %305 = vrot.lane.b32.xlu1 %v4677_v17, %s4556_s9 }
 0x172   :  { %308 = vrot.lane.b32.xlu0 %v4677_v17, %s4555_s8  ;;  %311 = vrot.lane.b32.xlu1 %v4677_v17, %s4557_s11 }
 0x1cc   :  { %v514_v35 = vpop.permute.xlu1 %513  ;;  %v508_v36 = vpop.permute.xlu0 %507 }
 0x1cd   :  { %v2292_v55 = vrot.slane %v508_v36, 4  ;;  %v2294_v8 = vrot.slane %v514_v35, 4 }
 0x1d0   :  { %v517_v40 = vpop.permute.xlu1 %516  ;;  %v511_v41 = vpop.permute.xlu0 %510 }
 0x1d1   :  { %v2295_v42 = vrot.slane %v517_v40, 4  ;;  %v528_v46 = vcombine.low %v4675_v16, %v517_v40  ;;  %v2293_v50 = vrot.slane %v511_v41, 4 }
 0x1d3   :  { %v2307_v47 = vcombine.low %v2291_v43, %v2295_v42  ;;  %v535_v58 = vrot.slane %v528_v46, %v4721_v44 }
 0x1d4   :  { %v523_v48 = vpop.permute.xlu1 %522  ;;  %v520_v49 = vpop.permute.xlu0 %519 }
 0x1d5   :  { %v536_v51 = vcombine.low %v511_v41, %v523_v48  ;;  %v2297_v53 = vrot.slane %v523_v48, 4  ;;  %v2296_v56 = vrot.slane %v520_v49, 4  ;;  %v2314_v62 = vrot.slane %v2307_v47, %v4721_v44 }
 0x1d6   :  { %v562_v63 = vcombine.low %v508_v36, %v520_v49 }
 0x1d7   :  { %v543_v60 = vrot.slane %v536_v51, %v4721_v44  ;;  %v2315_v61 = vcombine.low %v2293_v50, %v2297_v53  ;;  %v2341_v1 = vcombine.low %v2292_v55, %v2296_v56 }
 0x1d8   :  { %v526_v2 = vpop.permute.xlu0 %525  ;;  %v4730_v3 = vpop.permute.xlu1 %293  ;;  %v569_v14 = vrot.slane %v562_v63, %v4721_v44 }
 0x1d9   :  { %v544_v4 = vcombine.low %v535_v58, %v543_v60  ;;  %v545_v5 = vcombine.high %v535_v58, %v543_v60  ;;  %v2322_v6 = vrot.slane %v2315_v61, %v4721_v44  ;;  %v570_v7 = vcombine.low %v514_v35, %v526_v2 }
 0x1da   :  { %v2298_v9 = vrot.slane %v526_v2, 4  ;;  %v2348_v24 = vrot.slane %v2341_v1, %v4721_v44  ;;  %v2084_v33 = vrot.slane %v4730_v3, 4  ;;  %v2083_v35 = vrot.slane %v4677_v17, 4 }
 0x1db   :  { %v4734_v10 = vrot.slane %v544_v4, %v4725_v57  ;;  %v4737_v11 = vrot.slane %v545_v5, %v4725_v57  ;;  %v2323_v12 = vcombine.low %v2314_v62, %v2322_v6  ;;  %v2324_v13 = vcombine.high %v2314_v62, %v2322_v6 }
 0x1dc   :  { %v577_v15 = vrot.slane %v570_v7, %v4721_v44  ;;  %v2349_v16 = vcombine.low %v2294_v8, %v2298_v9  ;;  %v4741_v18 = vpop.permute.xlu0 %296  ;;  %v4743_v19 = vpop.permute.xlu1 %299 }
 0x1dd   :  { %v4747_v22 = vcombine.high %v4734_v10, %v4549_v0  ;;  %v4751_v23 = vcombine.high %v4737_v11, %v4549_v0  ;;  %v4756_v26 = vrot.slane %v2323_v12, %v4725_v57  ;;  %v4759_v27 = vrot.slane %v2324_v13, %v4725_v57 }
 0x1de   :  { %v578_v20 = vcombine.low %v569_v14, %v577_v15  ;;  %v579_v21 = vcombine.high %v569_v14, %v577_v15  ;;  %v2356_v25 = vrot.slane %v2349_v16, %v4721_v44  ;;  %v600_v31 = vshrl.u32 %v4734_v10, 16 }
 0x1df   :  { %v608_v37 = vshrl.u32 %v4747_v22, 16  ;;  %v616_v38 = vshrl.u32 %v4737_v11, 16  ;;  %v624_v39 = vshrl.u32 %v4751_v23, 16  ;;  %v2085_v40 = vrot.slane %v4741_v18, 4 }
 0x1e0   :  { %v4762_v28 = vrot.slane %v578_v20, %v4725_v57  ;;  %v2357_v29 = vcombine.low %v2348_v24, %v2356_v25  ;;  %v2358_v30 = vcombine.high %v2348_v24, %v2356_v25  ;;  %v4766_v32 = vrot.slane %v579_v21, %v4725_v57  ;;  %v303_v34 = vpop.permute.xlu0 %302  ;;  %v306_v36 = vpop.permute.xlu1 %305 }
 0x1e1   :  { %v4776_v41 = vcombine.high %v4756_v26, %v4549_v0  ;;  %v4780_v42 = vcombine.high %v4759_v27, %v4549_v0  ;;  %v2379_v46 = vshrl.u32 %v4756_v26, 16  ;;  %v2395_v47 = vshrl.u32 %v4759_v27, 16 }
 0x1e2   :  { %v4783_v43 = vrot.slane %v2357_v29, %v4725_v57  ;;  %v4786_v45 = vrot.slane %v2358_v30, %v4725_v57  ;;  %v4792_v48 = vcombine.high %v4762_v28, %v4549_v0  ;;  %v2086_v49 = vrot.slane %v4743_v19, 4 }
 0x1e3   :  { %v4797_v50 = vcombine.high %v4766_v32, %v4549_v0  ;;  %v598_v51 = vpack.i.b16 %v4762_v28, %v4734_v10  ;;  %v314_v55 = vcombine.low %v4677_v17, %v303_v34  ;;  %v601_v56 = vshrl.u32 %v4762_v28, 16 }
 0x1e4   :  { %v4803_v53 = vcombine.high %v4783_v43, %v4549_v0  ;;  %v4809_v58 = vcombine.high %v4786_v45, %v4549_v0  ;;  %v2377_v60 = vpack.i.b16 %v4783_v43, %v4756_v26  ;;  %v2380_v61 = vshrl.u32 %v4783_v43, 16  ;;  %v309_v2 = vpop.permute.xlu0 %308  ;;  %v312_v4 = vpop.permute.xlu1 %311 }
 0x1e5   :  { %v614_v62 = vpack.i.b16 %v4766_v32, %v4737_v11  ;;  %v617_v63 = vshrl.u32 %v4766_v32, 16  ;;  %v2393_v17 = vpack.i.b16 %v4786_v45, %v4759_v27  ;;  %v606_v5 = vpack.i.b16 %v4792_v48, %v4747_v22 }
 0x1e6   :  { %v2385_v1 = vpack.i.b16 %v4803_v53, %v4776_v41  ;;  %v4823_v6 = vpack.i.b16 %v2380_v61, %v2379_v46  ;;  %v2396_v7 = vshrl.u32 %v4786_v45, 16  ;;  %v2401_v8 = vpack.i.b16 %v4809_v58, %v4780_v42 }
 0x1e7   :  { %v609_v9 = vshrl.u32 %v4792_v48, 16  ;;  %v2087_v12 = vrot.slane %v303_v34, 4  ;;  %v348_v13 = vcombine.low %v4730_v3, %v306_v36  ;;  %v2088_v14 = vrot.slane %v306_v36, 4 }
 0x1e8   :  { %v4830_v15 = vpack.i.b16 %v2396_v7, %v2395_v47  ;;  %v322_v16 = vcombine.low %v4741_v18, %v309_v2  ;;  %v2089_v20 = vrot.slane %v309_v2, 4  ;;  %v356_v21 = vcombine.low %v4743_v19, %v312_v4 }
 0x1e9   :  { %v321_v24 = vrot.slane %v314_v55, %v4721_v44  ;;  %v2099_v25 = vcombine.low %v2083_v35, %v2087_v12  ;;  %v2133_v28 = vcombine.low %v2084_v33, %v2088_v14  ;;  %v2090_v29 = vrot.slane %v312_v4, 4 }
 0x1ea   :  { %v355_v30 = vrot.slane %v348_v13, %v4721_v44  ;;  %v329_v32 = vrot.slane %v322_v16, %v4721_v44  ;;  %v2107_v34 = vcombine.low %v2085_v40, %v2089_v20  ;;  %v363_v3 = vrot.slane %v356_v21, %v4721_v44 }
 0x1eb   :  { %v622_v36 = vpack.i.b16 %v4797_v50, %v4751_v23  ;;  %v625_v18 = vshrl.u32 %v4797_v50, 16  ;;  %v2106_v46 = vrot.slane %v2099_v25, %v4721_v44  ;;  %v2141_v19 = vcombine.low %v2086_v49, %v2090_v29 }
 0x1ec   :  { %v330_v47 = vcombine.low %v321_v24, %v329_v32  ;;  %v331_v48 = vcombine.high %v321_v24, %v329_v32  ;;  %v2114_v33 = vrot.slane %v2107_v34, %v4721_v44  ;;  %v364_v35 = vcombine.low %v355_v30, %v363_v3 }
 0x1ed   :  { %v628_v55 = vcombine.low %v598_v51, %v614_v62  ;;  %v2140_v61 = vrot.slane %v2133_v28, %v4721_v44  ;;  %v365_v2 = vcombine.high %v355_v30, %v363_v3  ;;  %v2148_v40 = vrot.slane %v2141_v19, %v4721_v44 }
 0x1ee   :  { %v338_v4 = vrot.slane %v330_v47, %v4725_v57  ;;  %v345_v7 = vrot.slane %v331_v48, %v4725_v57  ;;  %v2115_v12 = vcombine.low %v2106_v46, %v2114_v33  ;;  %v2116_v50 = vcombine.high %v2106_v46, %v2114_v33 }
 0x1ef   :  { %v372_v13 = vrot.slane %v364_v35, %v4725_v57  ;;  %v379_v49 = vrot.slane %v365_v2, %v4725_v57  ;;  %v2149_v14 = vcombine.low %v2140_v61, %v2148_v40  ;;  %v2150_v16 = vcombine.high %v2140_v61, %v2148_v40 }
 0x1f0   :  { %v4851_v51 = vpack.i.b16 %v601_v56, %v600_v31  ;;  %v346_v62 = vcombine.high %v338_v4, %v4549_v0  ;;  %v347_v20 = vcombine.high %v345_v7, %v4549_v0  ;;  %v636_v21 = vcombine.low %v606_v5, %v622_v36 }
 0x1f1   :  { %v618_v24 = vpack.i.b16 %v617_v63, %v616_v38  ;;  %v2123_v25 = vrot.slane %v2115_v12, %v4725_v57  ;;  %v2130_v28 = vrot.slane %v2116_v50, %v4725_v57  ;;  %v380_v29 = vcombine.high %v372_v13, %v4549_v0 }
 0x1f2   :  { %v386_v30 = vshrl.u32 %v338_v4, 16  ;;  %v394_v32 = vshrl.u32 %v346_v62, 16  ;;  %v381_v10 = vcombine.high %v379_v49, %v4549_v0  ;;  %v387_v31 = vshrl.u32 %v372_v13, 16 }
 0x1f3   :  { %v610_v56 = vpack.i.b16 %v609_v9, %v608_v37  ;;  %v626_v5 = vpack.i.b16 %v625_v18, %v624_v39  ;;  %v402_v34 = vshrl.u32 %v345_v7, 16  ;;  %v635_v11 = vrot.slane %v628_v55, %v4721_v44 }
 0x1f4   :  { %v410_v38 = vshrl.u32 %v347_v20, 16  ;;  %v2131_v63 = vcombine.high %v2123_v25, %v4549_v0  ;;  %v395_v3 = vshrl.u32 %v380_v29, 16  ;;  %v643_v36 = vrot.slane %v636_v21, %v4721_v44 }
 0x1f5   :  { %v2132_v46 = vcombine.high %v2130_v28, %v4549_v0  ;;  %v2171_v19 = vshrl.u32 %v2123_v25, 16  ;;  %v384_v47 = vpack.i.b16 %v372_v13, %v338_v4  ;;  %v403_v48 = vshrl.u32 %v379_v49, 16 }
 0x1f6   :  { %v388_v33 = vpack.i.b16 %v387_v31, %v386_v30  ;;  %v396_v22 = vpack.i.b16 %v395_v3, %v394_v32  ;;  %v411_v37 = vshrl.u32 %v381_v10, 16  ;;  %v2157_v23 = vrot.slane %v2149_v14, %v4725_v57 }
 0x1f7   :  { %v392_v39 = vpack.i.b16 %v380_v29, %v346_v62  ;;  %v404_v9 = vpack.i.b16 %v403_v48, %v402_v34  ;;  %v408_v18 = vpack.i.b16 %v381_v10, %v347_v20  ;;  %v2164_v35 = vrot.slane %v2150_v16, %v4725_v57 }
 0x1f8   :  { %v2179_v55 = vshrl.u32 %v2131_v63, 16  ;;  %v412_v61 = vpack.i.b16 %v411_v37, %v410_v38  ;;  %v2165_v2 = vcombine.high %v2157_v23, %v4549_v0  ;;  %v2169_v40 = vpack.i.b16 %v2157_v23, %v2123_v25 }
 0x1f9   :  { %v2187_v12 = vshrl.u32 %v2130_v28, 16  ;;  %v400_v50 = vpack.i.b16 %v379_v49, %v345_v7  ;;  %v2166_v4 = vcombine.high %v2164_v35, %v4549_v0  ;;  %v2172_v13 = vshrl.u32 %v2157_v23, 16 }
 0x1fa   :  { %v456_v21 = vcombine.low %v396_v22, %v412_v61  ;;  %v2177_v30 = vpack.i.b16 %v2165_v2, %v2131_v63  ;;  %v2180_v32 = vshrl.u32 %v2165_v2, 16  ;;  %v2185_v31 = vpack.i.b16 %v2164_v35, %v2130_v28 }
 0x1fb   :  { %v2195_v14 = vshrl.u32 %v2132_v46, 16  ;;  %v422_v62 = vcombine.low %v392_v39, %v408_v18  ;;  %v448_v29 = vcombine.low %v388_v33, %v404_v9  ;;  %v4873_v20 = vpack.i.b16 %v2172_v13, %v2171_v19 }
 0x1fc   :  { %v4875_v16 = vpack.i.b16 %v2180_v32, %v2179_v55  ;;  %v2188_v10 = vshrl.u32 %v2164_v35, 16  ;;  %v2193_v34 = vpack.i.b16 %v2166_v4, %v2132_v46  ;;  %v662_v25 = vcombine.low %v4851_v51, %v618_v24 }
 0x1fd   :  { %v414_v38 = vcombine.low %v384_v47, %v400_v50  ;;  %v463_v7 = vrot.slane %v456_v21, %v4721_v44  ;;  %v2196_v49 = vshrl.u32 %v2166_v4, 16  ;;  %v2199_v3 = vcombine.low %v2169_v40, %v2185_v31 }
 0x1fe   :  { %v2189_v48 = vpack.i.b16 %v2188_v10, %v2187_v12  ;;  %v2207_v63 = vcombine.low %v2177_v30, %v2193_v34  ;;  %v670_v22 = vcombine.low %v610_v56, %v626_v5  ;;  %v429_v28 = vrot.slane %v422_v62, %v4721_v44 }
 0x1ff   :  { %v455_v33 = vrot.slane %v448_v29, %v4721_v44  ;;  %v4881_v19 = vpack.i.b16 %v2196_v49, %v2195_v14  ;;  %v644_v37 = vcombine.low %v635_v11, %v643_v36  ;;  %v669_v46 = vrot.slane %v662_v25, %v4721_v44 }
 0x200   :  { %v2233_v23 = vcombine.low %v4873_v20, %v2189_v48  ;;  %v677_v51 = vrot.slane %v670_v22, %v4721_v44  ;;  %v645_v24 = vcombine.high %v635_v11, %v643_v36  ;;  %v421_v47 = vrot.slane %v414_v38, %v4721_v44 }
 0x201   :  { %v2241_v39 = vcombine.low %v4875_v16, %v4881_v19  ;;  %v464_v56 = vcombine.low %v455_v33, %v463_v7  ;;  %v465_v35 = vcombine.high %v455_v33, %v463_v7  ;;  %v652_v55 = vrot.slane %v644_v37, %v4725_v57 }
 0x202   :  { %v678_v5 = vcombine.low %v669_v46, %v677_v51  ;;  %v679_v9 = vcombine.high %v669_v46, %v677_v51  ;;  %v430_v18 = vcombine.low %v421_v47, %v429_v28  ;;  %v4892_v2 = vrot.slane %v645_v24, %v4725_v57 }
 0x203   :  { %v431_v11 = vcombine.high %v421_v47, %v429_v28  ;;  %v472_v36 = vrot.slane %v464_v56, %v4725_v57  ;;  %v2387_v4 = vshrl.u32 %v4776_v41, 16  ;;  %v4903_v21 = vrot.slane %v465_v35, %v4725_v57 }
 0x204   :  { %v686_v61 = vrot.slane %v678_v5, %v4725_v57  ;;  %v4895_v40 = vrot.slane %v679_v9, %v4725_v57  ;;  %v438_v13 = vrot.slane %v430_v18, %v4725_v57  ;;  %v2403_v62 = vshrl.u32 %v4780_v42, 16 }
 0x205   :  { %v2388_v29 = vshrl.u32 %v4803_v53, 16  ;;  %v4914_v20 = vrot.slane %v431_v11, %v4725_v57  ;;  %v486_v10 = vshrl.u32 %v472_v36, 16  ;;  %v2404_v34 = vshrl.u32 %v4809_v58, 16 }
 0x206   :  { %v698_v12 = vpack.i.b16 %v686_v61, %v652_v55  ;;  %v710_v50 = vpack.i.b16 %v4895_v40, %v4892_v2  ;;  %v700_v31 = vshrl.u32 %v686_v61, 16  ;;  %v4909_v14 = vcombine.high %v4895_v40, %v4549_v0 }
 0x207   :  { %v4918_v25 = vrot.slane %v2199_v3, %v4721_v44  ;;  %v699_v38 = vshrl.u32 %v652_v55, 16  ;;  %v4924_v7 = vcombine.high %v4892_v2, %v4549_v0  ;;  %v4927_v49 = vrot.slane %v2207_v63, %v4721_v44 }
 0x208   :  { %v939_v30 = vsel %vm934_vm1, %v698_v12, 0  ;;  %v1123_v32 = vsel %vm934_vm1, %v710_v50, 0  ;;  %v485_v48 = vshrl.u32 %v438_v13, 16  ;;  %v4930_v22 = vcombine.high %v686_v61, %v4549_v0 }
 0x209   :  { %4073 = vmatpush3.bf16.xpose.msra.mxu1 %v939_v30  ;;  %4097 = vmatpush3.bf16.xpose.msra.mxu0 %v1123_v32  ;;  %v4934_v3 = vcombine.high %v4903_v21, %v4549_v0  ;;  %v484_v28 = vpack.i.b16 %v472_v36, %v438_v13  ;;  %v701_v33 = vpack.i.b16 %v700_v31, %v699_v38 }
 0x20a   :  { %4078 = vmatprep.subr.bf16.mxu1 %v5737_v52  ;;  %4108 = vmatprep.subr.bf16.mxu0 %v5737_v52  ;;  %v496_v37 = vpack.i.b16 %v4903_v21, %v4914_v20  ;;  %v716_v46 = vpack.i.b16 %v4909_v14, %v4924_v7  ;;  %v4941_v51 = vrot.slane %v2233_v23, %v4721_v44 }
 0x20b   :  { %v487_v63 = vpack.i.b16 %v486_v10, %v485_v48  ;;  %v4944_v24 = vcombine.high %v652_v55, %v4549_v0  ;;  %v4948_v47 = vcombine.high %v4914_v20, %v4549_v0  ;;  %v4951_v56 = vcombine.high %v438_v13, %v4549_v0 }
 0x20c   :  { %v4954_v5 = vcombine.high %v472_v36, %v4549_v0  ;;  %v2389_v9 = vpack.i.b16 %v2388_v29, %v2387_v4  ;;  %v2405_v18 = vpack.i.b16 %v2404_v34, %v2403_v62  ;;  %v2407_v55 = vcombine.low %v2377_v60, %v2393_v17 }
 0x20d   :  { %v704_v23 = vpack.i.b16 %v4930_v22, %v4944_v24  ;;  %v502_v35 = vpack.i.b16 %v4934_v3, %v4948_v47  ;;  %v2415_v61 = vcombine.low %v2385_v1, %v2401_v8  ;;  %v985_v11 = vsel %vm934_vm1, %v701_v33, 0 }
 0x20e   :  { %v1215_v36 = vsel %vm934_vm1, %v716_v46, 0  ;;  %v2441_v27 = vcombine.low %v4823_v6, %v4830_v15  ;;  %v2449_v26 = vcombine.low %v2389_v9, %v2405_v18  ;;  %v2414_v42 = vrot.slane %v2407_v55, %v4721_v44 }
 0x20f   :  { %v2422_v43 = vrot.slane %v2415_v61, %v4721_v44  ;;  %v2215_v41 = vcombine.low %v4918_v25, %v4927_v49  ;;  %v2248_v58 = vrot.slane %v2241_v39, %v4721_v44  ;;  %v705_v60 = vshrl.u32 %v4944_v24, 16 }
 0x210   :  { %4075 = vmatmul.mubr.msk.bf16.vlgmr.msra.gmra.mrb[4].mxu1 %vm934_vm1, %v484_v28  ;;  %4099 = vmatmul.mubr.msk.bf16.vlgmr.msra.gmra.mrb[4].mxu0 %vm934_vm1, %v496_v37  ;;  %v2448_v45 = vrot.slane %v2441_v27, %v4721_v44  ;;  %v2456_v53 = vrot.slane %v2449_v26, %v4721_v44  ;;  %v2216_v16 = vcombine.high %v4918_v25, %v4927_v49  ;;  %v1031_v19 = vsel %vm934_vm1, %v704_v23, 0 }
 0x211   :  { %4079 = vmatpush3.bf16.xpose.msra.mxu1 %v985_v11  ;;  %4109 = vmatpush3.bf16.xpose.msra.mxu0 %v1215_v36  ;;  %v2423_v1 = vcombine.low %v2414_v42, %v2422_v43  ;;  %v4996_v17 = vrot.slane %v2215_v41, %v4725_v57  ;;  %v2424_v6 = vcombine.high %v2414_v42, %v2422_v43  ;;  %v706_v39 = vshrl.u32 %v4930_v22, 16 }
 0x212   :  { %4080 = vmatprep.mubr.msk.bf16.mxu1 %vm4558_vm0, %v5737_v52  ;;  %4084 = vmatprep.subr.bf16.mxu1 %v5737_v52  ;;  %v2457_v8 = vcombine.low %v2448_v45, %v2456_v53  ;;  %v2249_v15 = vcombine.low %v4941_v51, %v2248_v58  ;;  %v2458_v12 = vcombine.high %v2448_v45, %v2456_v53  ;;  %v712_v41 = vshrl.u32 %v4895_v40, 16 }
 0x213   :  { %4110 = vmatprep.mubr.msk.bf16.mxu0 %vm4558_vm0, %v5737_v52  ;;  %4120 = vmatprep.subr.bf16.mxu0 %v5737_v52  ;;  %v5004_v50 = vrot.slane %v2423_v1, %v4725_v57  ;;  %v2270_v4 = vshrl.u32 %v4996_v17, 16  ;;  %v5015_v32 = vcombine.high %v4996_v17, %v4549_v0  ;;  %v5026_v10 = vrot.slane %v2424_v6, %v4725_v57 }
 0x214   :  { %v5008_v13 = vrot.slane %v2457_v8, %v4725_v57  ;;  %v5011_v30 = vrot.slane %v2249_v15, %v4725_v57  ;;  %v5018_v31 = vrot.slane %v2458_v12, %v4725_v57  ;;  %v2250_v34 = vcombine.high %v4941_v51, %v2248_v58 }
 0x215   :  { %v2478_v62 = vshrl.u32 %v5004_v50, 16  ;;  %v5023_v29 = vcombine.high %v5004_v50, %v4549_v0  ;;  %v5050_v37 = vrot.slane %v2216_v16, %v4725_v57  ;;  %v2276_v23 = vshrl.u32 %v5015_v32, 16 }
 0x216   :  { %v2479_v49 = vshrl.u32 %v5008_v13, 16  ;;  %v5038_v48 = vcombine.high %v5008_v13, %v4549_v0  ;;  %v2271_v22 = vshrl.u32 %v5011_v30, 16  ;;  %v5045_v28 = vcombine.high %v5011_v30, %v4549_v0 }
 0x217   :  { %5745 = vst [vmem:[#allocation16_spill] sm:$0xff] %v5050_v37  ;;  %v490_v55 = vpack.i.b16 %v4954_v5, %v4951_v56  ;;  %v707_v61 = vpack.i.b16 %v706_v39, %v705_v60  ;;  %v5072_v36 = vrot.slane %v2250_v34, %v4725_v57  ;;  %v2490_v26 = vshrl.u32 %v5026_v10, 16 }
 0x218   :  { %4081 = vmatmul.mubr.msk.bf16.vlgmr.msra.gmra.mrb[8].mxu1 %vm934_vm1, %v487_v63  ;;  %4111 = vmatmul.mubr.msk.bf16.vlgmr.msra.gmra.mrb[8].mxu0 %vm934_vm1, %v502_v35  ;;  %v5055_v46 = vpack.i.b16 %v2479_v49, %v2478_v62  ;;  %v2484_v63 = vshrl.u32 %v5023_v29, 16  ;;  %v2485_v24 = vshrl.u32 %v5038_v48, 16  ;;  %v5061_v9 = vpack.i.b16 %v2271_v22, %v2270_v4 }
 0x219   :  { %4085 = vmatpush3.bf16.xpose.msra.mxu1 %v1031_v19  ;;  %4086 = vmatprep.mubr.msk.bf16.mxu1 %vm4558_vm0, %v5737_v52  ;;  %v2277_v35 = vshrl.u32 %v5045_v28, 16  ;;  %5746 = vst [vmem:[#allocation17_spill] sm:$0xff] %v5072_v36  ;;  %v2491_v42 = vshrl.u32 %v5018_v31, 16  ;;  %v5080_v43 = vcombine.high %v5026_v10, %v4549_v0  ;;  %v5087_v53 = vcombine.high %v5018_v31, %v4549_v0 }
 0x21a   :  { %4090 = vmatprep.subr.bf16.mxu1 %v5737_v52  ;;  %4122 = vmatprep.mubr.msk.bf16.mxu0 %vm4558_vm0, %v5737_v52  ;;  %v5069_v11 = vpack.i.b16 %v2485_v24, %v2484_v63  ;;  %v2282_v58 = vshrl.u32 %v5050_v37, 16  ;;  %v2283_v1 = vshrl.u32 %v5072_v36, 16  ;;  %v5095_v6 = vcombine.high %v5050_v37, %v4549_v0 }
 0x21b   :  { %v5074_v27 = vpack.i.b16 %v2277_v35, %v2276_v23  ;;  %5747 = vst [vmem:[#allocation18_spill] sm:$0xff] %v5080_v43  ;;  %5748 = vst [vmem:[#allocation19_spill] sm:$0xff] %v5087_v53  ;;  %v5090_v60 = vpack.i.b16 %v2491_v42, %v2490_v26  ;;  %v5099_v40 = vcombine.high %v5072_v36, %v4549_v0  ;;  %v1077_v8 = vsel %vm934_vm1, %v707_v61, 0 }
 0x21c   :  { %5749 = vst [vmem:[#allocation20_spill] sm:$0xff] %v5095_v6  ;;  %v2496_v12 = vshrl.u32 %v5080_v43, 16  ;;  %v2497_v16 = vshrl.u32 %v5087_v53, 16  ;;  %v492_v19 = vshrl.u32 %v4954_v5, 16  ;;  %v5110_v39 = vpack.i.b16 %v2283_v1, %v2282_v58  ;;  %v280_v1 = vpop.f32.mrb[0].mxu1 }
 0x21d   :  { %5750 = vst [vmem:[#allocation21_spill] sm:$0xff] %v5099_v40  ;;  %v711_v62 = vshrl.u32 %v4892_v2, 16  ;;  %v2288_v49 = vshrl.u32 %v5095_v6, 16  ;;  %v2289_v22 = vshrl.u32 %v5099_v40, 16  ;;  %v491_v63 = vshrl.u32 %v4951_v56, 16 }
 0x21e   :  { %5751 = vst [vmem:[#allocation22_spill] sm:$0xff] %v5110_v39  ;;  %v5116_v34 = vpack.i.b16 %v2497_v16, %v2496_v12  ;;  %v498_v2 = vshrl.u32 %v4903_v21, 16  ;;  %v717_v56 = vshrl.u32 %v4924_v7, 16  ;;  %v497_v61 = vshrl.u32 %v4914_v20, 16  ;;  %v4070_v12 = vpop.f32.mrb[1].mxu1 }
 0x21f   :  { %v713_v24 = vpack.i.b16 %v712_v41, %v711_v62  ;;  %v5121_v23 = vpack.i.b16 %v2289_v22, %v2288_v49  ;;  %v493_v5 = vpack.i.b16 %v492_v19, %v491_v63  ;;  %v503_v21 = vshrl.u32 %v4948_v47, 16  ;;  %v283_v16 = vpop.f32.mrb[2].mxu1 }
 0x220   :  { %4087 = vmatmul.mubr.msk.bf16.vlgmr.msra.gmra.mrb[12].mxu1 %vm934_vm1, %v490_v55  ;;  %5752 = vst [vmem:[#allocation23_spill] sm:$0xff] %v5116_v34  ;;  %v718_v55 = vshrl.u32 %v4909_v14, 16  ;;  %v499_v42 = vpack.i.b16 %v498_v2, %v497_v61  ;;  %v504_v14 = vshrl.u32 %v4934_v3, 16  ;;  %v198_v20 = vsub.s32 2, %v4664_v54  ;;  %v4071_v3 = vpop.f32.mrb[3].mxu1 }
 0x221   :  { %4091 = vmatpush3.bf16.xpose.msra.mxu1 %v1077_v8  ;;  %4092 = vmatprep.mubr.msk.bf16.mxu1 %vm4558_vm0, %v5737_v52  ;;  %5753 = vst [vmem:[#allocation24_spill] sm:$0xff] %v5121_v23  ;;  %v1169_v35 = vsel %vm934_vm1, %v713_v24, 0 }
 0x222   :  { %4102 = vmatprep.subr.bf16.mxu1 %v5737_v52  ;;  %v719_v26 = vpack.i.b16 %v718_v55, %v717_v56  ;;  %v505_v58 = vpack.i.b16 %v504_v14, %v503_v21  ;;  %v199_v7 = vrot.slane %v4667_v59, %v198_v20 }
 0x224   :  { %v1261_v41 = vsel %vm934_vm1, %v719_v26, 0  ;;  %v281_v8 = vadd.f32 %v280_v1, %v199_v7  ;;  %v284_v19 = vadd.f32 %v283_v16, %v199_v7 }
 0x226   :  { %v5144_v62 = vpack.c.bf16 %v284_v19, %v281_v8 }
 0x228   :  { %4093 = vmatmul.mubr.msk.bf16.vlgmr.msra.gmra.mrb[16].mxu1 %vm934_vm1, %v493_v5 }
 0x229   :  { %4103 = vmatpush3.bf16.xpose.msra.mxu1 %v1169_v35  ;;  %4104 = vmatprep.mubr.msk.bf16.mxu1 %vm4558_vm0, %v5737_v52 }
 0x22a   :  { %4114 = vmatprep.subr.bf16.mxu1 %v5737_v52 }
 0x230   :  { %4105 = vmatmul.mubr.msk.bf16.vlgmr.msra.gmra.mrb[20].mxu1 %vm934_vm1, %v499_v42 }
 0x231   :  { %4115 = vmatpush3.bf16.xpose.msra.mxu1 %v1261_v41  ;;  %4116 = vmatprep.mubr.msk.bf16.mxu1 %vm4558_vm0, %v5737_v52 }
 0x232   :  { %4126 = vmatprep.subr.bf16.mxu1 %v5737_v52 }
 0x238   :  { %4117 = vmatmul.mubr.msk.bf16.vlgmr.msra.gmra.mrb[24].mxu1 %vm934_vm1, %v505_v58 }
 0x239   :  { %4128 = vmatprep.mubr.msk.bf16.mxu1 %vm4558_vm0, %v5737_v52 }
 0x2e3   :  { %v975_v47 = vpop.f32.mrb[4].mxu1  ;;  %v5146_v49 = vpop.f32.mrb[4].mxu0 }
 0x2e4   :  { %v4076_v22 = vpop.f32.mrb[5].mxu1  ;;  %v4100_v63 = vpop.f32.mrb[5].mxu0  ;;  %v1304_v24 = vsel %vm1303_vm2, %v975_v47, -inf  ;;  %v1316_v58 = vsel %vm1303_vm2, %v5146_v49, -inf }
 0x2e5   :  { %v1162_v5 = vpop.f32.mrb[6].mxu0  ;;  %1305 = vmax.xlane.f32.xlu0 %v1304_v24  ;;  %v978_v54 = vpop.f32.mrb[6].mxu1 }
 0x2e6   :  { %v4077_v59 = vpop.f32.mrb[7].mxu1  ;;  %v4101_v35 = vpop.f32.mrb[7].mxu0 }
 0x2eb   :  { %v1021_v55 = vpop.f32.mrb[8].mxu1  ;;  %v5149_v2 = vpop.f32.mrb[8].mxu0 }
 0x2ec   :  { %v4082_v56 = vpop.f32.mrb[9].mxu1  ;;  %v4112_v61 = vpop.f32.mrb[9].mxu0  ;;  %v1307_v26 = vsel %vm1303_vm2, %v1021_v55, -inf  ;;  %v1322_v1 = vsel %vm1303_vm2, %v5149_v2, -inf }
 0x2ed   :  { %v1254_v42 = vpop.f32.mrb[10].mxu0  ;;  %1308 = vmax.xlane.f32.xlu1 %v1307_v26  ;;  %v1024_v41 = vpop.f32.mrb[10].mxu1 }
 0x2ee   :  { %v4083_v14 = vpop.f32.mrb[11].mxu1  ;;  %v4113_v21 = vpop.f32.mrb[11].mxu0 }
 0x2f1   :  { %1317 = vmax.xlane.f32.xlu1 %v1316_v58 }
 0x2f3   :  { %v1067_v20 = vpop.f32.mrb[12].mxu1 }
 0x2f4   :  { %v4088_v7 = vpop.f32.mrb[13].mxu1  ;;  %v1310_v8 = vsel %vm1303_vm2, %v1067_v20, -inf }
 0x2f5   :  { %1323 = vmax.xlane.f32.xlu1 %v1322_v1  ;;  %1311 = vmax.xlane.f32.xlu0 %v1310_v8  ;;  %v1070_v12 = vpop.f32.mrb[14].mxu1 }
 0x2f6   :  { %v4089_v16 = vpop.f32.mrb[15].mxu1 }
 0x2fb   :  { %v1113_v19 = vpop.f32.mrb[16].mxu1 }
 0x2fc   :  { %v4094_v3 = vpop.f32.mrb[17].mxu1  ;;  %v1313_v22 = vsel %vm1303_vm2, %v1113_v19, -inf }
 0x2fd   :  { %1314 = vmax.xlane.f32.xlu0 %v1313_v22  ;;  %v1116_v63 = vpop.f32.mrb[18].mxu1 }
 0x2fe   :  { %v4095_v24 = vpop.f32.mrb[19].mxu1 }
 0x303   :  { %v1205_v5 = vpop.f32.mrb[20].mxu1 }
 0x304   :  { %v4106_v54 = vpop.f32.mrb[21].mxu1  ;;  %v1319_v59 = vsel %vm1303_vm2, %v1205_v5, -inf }
 0x305   :  { %1320 = vmax.xlane.f32.xlu0 %v1319_v59  ;;  %v1208_v35 = vpop.f32.mrb[22].mxu1 }
 0x306   :  { %721 = vrot.lane.b32.xlu1 %v5144_v62, %s4552_s30  ;;  %v4107_v56 = vpop.f32.mrb[23].mxu1 }
 0x30a   :  { %727 = vrot.lane.b32.xlu1 %v5144_v62, %s4551_s4 }
 0x30b   :  { %v5163_v61 = vpop.f32.mrb[24].mxu1 }
 0x30c   :  { %v4118_v26 = vpop.f32.mrb[25].mxu1  ;;  %v1325_v42 = vsel %vm1303_vm2, %v5163_v61, -inf }
 0x30d   :  { %1326 = vmax.xlane.f32.xlu0 %v1325_v42  ;;  %v1300_v41 = vpop.f32.mrb[26].mxu1 }
 0x30e   :  { %730 = vrot.lane.b32.xlu1 %v5144_v62, %s4553_s6  ;;  %v4119_v14 = vpop.f32.mrb[27].mxu1 }
 0x312   :  { %736 = vrot.lane.b32.xlu1 %v5144_v62, %s4555_s8 }
 0x323   :  { %724 = vrot.lane.b32.xlu0 %v5144_v62, %s4554_s7 }
 0x327   :  { %733 = vrot.lane.b32.xlu0 %v5144_v62, %s4556_s9 }
 0x32b   :  { %739 = vrot.lane.b32.xlu0 %v5144_v62, %s4557_s11 }
 0x372   :  { %v1306_v21 = vpop.xlane.xlu0 %1305 }
 0x373   :  { %v1328_v58 = vsub.f32 %v975_v47, %v1306_v21 }
 0x375   :  { %v1336_v7 = vmul.f32 1.442695, %v1328_v58 }
 0x377   :  { %4336 = vpow2.f32 %v1336_v7 }
 0x37a   :  { %v1309_v1 = vpop.xlane.xlu1 %1308 }
 0x37b   :  { %v1329_v8 = vsub.f32 %v1021_v55, %v1309_v1 }
 0x37d   :  { %v1338_v12 = vmul.f32 1.442695, %v1329_v8 }
 0x37e   :  { %v1318_v16 = vpop.xlane.xlu1 %1317 }
 0x37f   :  { %4338 = vpow2.f32 %v1338_v12  ;;  %v1332_v22 = vsub.f32 %v5146_v49, %v1318_v16 }
 0x381   :  { %v5177_v3 = vpop.eup %4336  ;;  %v1344_v47 = vmul.f32 1.442695, %v1332_v22 }
 0x382   :  { %v1312_v63 = vpop.xlane.xlu0 %1311  ;;  %v1352_v24 = vsel %vm1303_vm2, %v5177_v3, 0.0  ;;  %v1324_v54 = vpop.xlane.xlu1 %1323 }
 0x383   :  { %v1330_v59 = vsub.f32 %v1067_v20, %v1312_v63  ;;  %1353 = vadd.xlane.f32.xlu1 %v1352_v24  ;;  %v1334_v56 = vsub.f32 %v5149_v2, %v1324_v54 }
 0x385   :  { %v1340_v35 = vmul.f32 1.442695, %v1330_v59  ;;  %v1348_v26 = vmul.f32 1.442695, %v1334_v56 }
 0x386   :  { %v5185_v42 = vpop.permute.xlu1 %721 }
 0x387   :  { %4340 = vpow2.f32 %v1340_v35 }
 0x388   :  { %4342 = vpow2.f32 %v1344_v47  ;;  %v2499_v47 = vrot.slane %v5144_v62, 4 }
 0x389   :  { %v5183_v55 = vpop.eup %4338  ;;  %4344 = vpow2.f32 %v1348_v26 }
 0x38a   :  { %v1315_v41 = vpop.xlane.xlu0 %1314  ;;  %v1355_v49 = vsel %vm1303_vm2, %v5183_v55, 0.0  ;;  %v728_v20 = vpop.permute.xlu1 %727 }
 0x38b   :  { %v1331_v14 = vsub.f32 %v1113_v19, %v1315_v41  ;;  %1356 = vadd.xlane.f32.xlu0 %v1355_v49 }
 0x38d   :  { %v1342_v21 = vmul.f32 1.442695, %v1331_v14 }
 0x38e   :  { %v731_v16 = vpop.permute.xlu1 %730 }
 0x38f   :  { %4346 = vpow2.f32 %v1342_v21  ;;  %v2503_v24 = vrot.slane %v731_v16, 4  ;;  %v742_v26 = vcombine.low %v5144_v62, %v731_v16 }
 0x391   :  { %v5189_v58 = vpop.eup %4340  ;;  %v2515_v49 = vcombine.low %v2499_v47, %v2503_v24 }
 0x392   :  { %v1321_v2 = vpop.xlane.xlu0 %1320  ;;  %v1358_v1 = vsel %vm1303_vm2, %v5189_v58, 0.0  ;;  %v5193_v8 = vpop.eup %4342 }
 0x393   :  { %v1333_v7 = vsub.f32 %v1205_v5, %v1321_v2  ;;  %1359 = vadd.xlane.f32.xlu0 %v1358_v1  ;;  %v1364_v19 = vsel %vm1303_vm2, %v5193_v8, 0.0  ;;  %v5197_v22 = vpop.eup %4344  ;;  %v737_v56 = vpop.permute.xlu1 %736  ;;  %v2522_v62 = vrot.slane %v2515_v49, %v4721_v44 }
 0x394   :  { %v1370_v35 = vsel %vm1303_vm2, %v5197_v22, 0.0  ;;  %v2505_v21 = vrot.slane %v737_v56, 4 }
 0x395   :  { %v1346_v12 = vmul.f32 1.442695, %v1333_v7 }
 0x397   :  { %4348 = vpow2.f32 %v1346_v12  ;;  %1365 = vadd.xlane.f32.xlu0 %v1364_v19 }
 0x399   :  { %v5199_v63 = vpop.eup %4346 }
 0x39a   :  { %v1327_v54 = vpop.xlane.xlu0 %1326  ;;  %v1361_v5 = vsel %vm1303_vm2, %v5199_v63, 0.0 }
 0x39b   :  { %v1335_v59 = vsub.f32 %v5163_v61, %v1327_v54  ;;  %1362 = vadd.xlane.f32.xlu1 %v1361_v5  ;;  %1371 = vadd.xlane.f32.xlu0 %v1370_v35  ;;  %v749_v61 = vrot.slane %v742_v26, %v4721_v44  ;;  %v2500_v35 = vrot.slane %v5185_v42, 4 }
 0x39d   :  { %v1350_v41 = vmul.f32 1.442695, %v1335_v59 }
 0x39e   :  { %v725_v14 = vpop.permute.xlu0 %724 }
 0x39f   :  { %4350 = vpow2.f32 %v1350_v41  ;;  %v750_v2 = vcombine.low %v725_v14, %v737_v56  ;;  %v2501_v7 = vrot.slane %v725_v14, 4 }
 0x3a1   :  { %v5208_v1 = vpop.eup %4348  ;;  %v757_v12 = vrot.slane %v750_v2, %v4721_v44  ;;  %v2523_v19 = vcombine.low %v2501_v7, %v2505_v21 }
 0x3a2   :  { %v734_v54 = vpop.permute.xlu0 %733  ;;  %v1367_v5 = vsel %vm1303_vm2, %v5208_v1, 0.0 }
 0x3a3   :  { %v758_v16 = vcombine.low %v749_v61, %v757_v12  ;;  %v759_v24 = vcombine.high %v749_v61, %v757_v12  ;;  %v2530_v59 = vrot.slane %v2523_v19, %v4721_v44  ;;  %1368 = vadd.xlane.f32.xlu1 %v1367_v5  ;;  %v2504_v47 = vrot.slane %v734_v54, 4 }
 0x3a4   :  { %v776_v7 = vcombine.low %v5185_v42, %v734_v54  ;;  %v2502_v5 = vrot.slane %v728_v20, 4 }
 0x3a5   :  { %v2531_v56 = vcombine.low %v2522_v62, %v2530_v59  ;;  %v2532_v41 = vcombine.high %v2522_v62, %v2530_v59  ;;  %v766_v26 = vrot.slane %v758_v16, %v4725_v57  ;;  %v773_v14 = vrot.slane %v759_v24, %v4725_v57 }
 0x3a6   :  { %v2549_v21 = vcombine.low %v2500_v35, %v2504_v47  ;;  %v740_v2 = vpop.permute.xlu0 %739  ;;  %v783_v24 = vrot.slane %v776_v7, %v4721_v44 }
 0x3a7   :  { %v5221_v49 = vrot.slane %v2531_v56, %v4725_v57  ;;  %v5224_v61 = vrot.slane %v2532_v41, %v4725_v57  ;;  %v784_v12 = vcombine.low %v728_v20, %v740_v2  ;;  %v2506_v4 = vrot.slane %v740_v2, 4 }
 0x3a8   :  { %v774_v62 = vcombine.high %v766_v26, %v4549_v0  ;;  %v775_v16 = vcombine.high %v773_v14, %v4549_v0  ;;  %v2556_v20 = vrot.slane %v2549_v21, %v4721_v44  ;;  %v814_v7 = vshrl.u32 %v766_v26, 16 }
 0x3a9   :  { %v5226_v19 = vpop.eup %4350  ;;  %v791_v59 = vrot.slane %v784_v12, %v4721_v44  ;;  %v2557_v42 = vcombine.low %v2502_v5, %v2506_v4  ;;  %v2547_v35 = vcombine.high %v5221_v49, %v4549_v0  ;;  %v2548_v47 = vcombine.high %v5224_v61, %v4549_v0 }
 0x3aa   :  { %v1373_v54 = vsel %vm1303_vm2, %v5226_v19, 0.0  ;;  %v822_v15 = vshrl.u32 %v774_v62, 16  ;;  %v830_v12 = vshrl.u32 %v773_v14, 16  ;;  %v838_v4 = vshrl.u32 %v775_v16, 16 }
 0x3ab   :  { %1374 = vadd.xlane.f32.xlu1 %v1373_v54  ;;  %v792_v56 = vcombine.low %v783_v24, %v791_v59  ;;  %v793_v41 = vcombine.high %v783_v24, %v791_v59  ;;  %v2564_v2 = vrot.slane %v2557_v42, %v4721_v44  ;;  %v2587_v51 = vshrl.u32 %v5221_v49, 16 }
 0x3ac   :  { %v2595_v38 = vshrl.u32 %v2547_v35, 16  ;;  %v2603_v54 = vshrl.u32 %v5224_v61, 16  ;;  %v2611_v21 = vshrl.u32 %v2548_v47, 16 }
 0x3ad   :  { %v800_v5 = vrot.slane %v792_v56, %v4725_v57  ;;  %v807_v45 = vrot.slane %v793_v41, %v4725_v57  ;;  %v2565_v33 = vcombine.low %v2556_v20, %v2564_v2  ;;  %v2566_v18 = vcombine.high %v2556_v20, %v2564_v2 }
 0x3af   :  { %v808_v24 = vcombine.high %v800_v5, %v4549_v0  ;;  %v809_v59 = vcombine.high %v807_v45, %v4549_v0  ;;  %v812_v42 = vpack.i.b16 %v800_v5, %v766_v26  ;;  %v815_v25 = vshrl.u32 %v800_v5, 16 }
 0x3b0   :  { %v828_v52 = vpack.i.b16 %v807_v45, %v773_v14  ;;  %v831_v23 = vshrl.u32 %v807_v45, 16  ;;  %v2573_v56 = vrot.slane %v2565_v33, %v4725_v57  ;;  %v2580_v41 = vrot.slane %v2566_v18, %v4725_v57 }
 0x3b1   :  { %v816_v6 = vpack.i.b16 %v815_v25, %v814_v7  ;;  %v820_v20 = vpack.i.b16 %v808_v24, %v774_v62  ;;  %v823_v2 = vshrl.u32 %v808_v24, 16  ;;  %v836_v40 = vpack.i.b16 %v809_v59, %v775_v16 }
 0x3b2   :  { %v832_v34 = vpack.i.b16 %v831_v23, %v830_v12  ;;  %v839_v39 = vshrl.u32 %v809_v59, 16  ;;  %v842_v43 = vcombine.low %v812_v42, %v828_v52  ;;  %v2581_v53 = vcombine.high %v2573_v56, %v4549_v0 }
 0x3b3   :  { %v824_v37 = vpack.i.b16 %v823_v2, %v822_v15  ;;  %v2582_v36 = vcombine.high %v2580_v41, %v4549_v0  ;;  %v2585_v26 = vpack.i.b16 %v2573_v56, %v5221_v49  ;;  %v2588_v14 = vshrl.u32 %v2573_v56, 16 }
 0x3b4   :  { %v840_v45 = vpack.i.b16 %v839_v39, %v838_v4  ;;  %v2593_v5 = vpack.i.b16 %v2581_v53, %v2547_v35  ;;  %v2596_v33 = vshrl.u32 %v2581_v53, 16  ;;  %v2601_v18 = vpack.i.b16 %v2580_v41, %v5224_v61 }
 0x3b5   :  { %v2589_v25 = vpack.i.b16 %v2588_v14, %v2587_v51  ;;  %v2604_v62 = vshrl.u32 %v2580_v41, 16  ;;  %v2609_v7 = vpack.i.b16 %v2582_v36, %v2548_v47  ;;  %v2612_v16 = vshrl.u32 %v2582_v36, 16 }
 0x3b6   :  { %v849_v23 = vrot.slane %v842_v43, %v4721_v44  ;;  %v850_v52 = vcombine.low %v820_v20, %v836_v40  ;;  %v876_v12 = vcombine.low %v816_v6, %v832_v34  ;;  %v884_v24 = vcombine.low %v824_v37, %v840_v45 }
 0x3b7   :  { %v2605_v15 = vpack.i.b16 %v2604_v62, %v2603_v54  ;;  %v2597_v59 = vpack.i.b16 %v2596_v33, %v2595_v38  ;;  %v2613_v42 = vpack.i.b16 %v2612_v16, %v2611_v21  ;;  %v2615_v2 = vcombine.low %v2585_v26, %v2601_v18 }
 0x3b8   :  { %v857_v49 = vrot.slane %v850_v52, %v4721_v44  ;;  %v883_v39 = vrot.slane %v876_v12, %v4721_v44  ;;  %v891_v53 = vrot.slane %v884_v24, %v4721_v44  ;;  %v2623_v61 = vcombine.low %v2593_v5, %v2609_v7 }
 0x3b9   :  { %v2649_v51 = vcombine.low %v2589_v25, %v2605_v15  ;;  %v2657_v35 = vcombine.low %v2597_v59, %v2613_v42  ;;  %v2622_v37 = vrot.slane %v2615_v2, %v4721_v44 }
 0x3ba   :  { %v858_v36 = vcombine.low %v849_v23, %v857_v49  ;;  %v892_v47 = vcombine.low %v883_v39, %v891_v53  ;;  %v859_v43 = vcombine.high %v849_v23, %v857_v49  ;;  %v893_v40 = vcombine.high %v883_v39, %v891_v53 }
 0x3bb   :  { %v2630_v38 = vrot.slane %v2623_v61, %v4721_v44  ;;  %v2656_v6 = vrot.slane %v2649_v51, %v4721_v44  ;;  %v2664_v34 = vrot.slane %v2657_v35, %v4721_v44  ;;  %v5754_v49 = vmov 0.0  }
 0x3bc   :  { %v866_v4 = vrot.slane %v858_v36, %v4725_v57  ;;  %v900_v54 = vrot.slane %v892_v47, %v4725_v57  ;;  %v5263_v21 = vrot.slane %v859_v43, %v4725_v57  ;;  %v5266_v56 = vrot.slane %v893_v40, %v4725_v57 }
 0x3bd   :  { %v2631_v41 = vcombine.low %v2622_v37, %v2630_v38  ;;  %v2665_v20 = vcombine.low %v2656_v6, %v2664_v34  ;;  %v2632_v26 = vcombine.high %v2622_v37, %v2630_v38  ;;  %v2666_v14 = vcombine.high %v2656_v6, %v2664_v34 }
 0x3be   :  { %v912_v45 = vpack.i.b16 %v900_v54, %v866_v4  ;;  %v913_v5 = vshrl.u32 %v866_v4, 16  ;;  %v914_v33 = vshrl.u32 %v900_v54, 16  ;;  %v874_v18 = vcombine.high %v866_v4, %v4549_v0 }
 0x3bf   :  { %v908_v25 = vcombine.high %v900_v54, %v4549_v0  ;;  %v924_v62 = vpack.i.b16 %v5266_v56, %v5263_v21  ;;  %v925_v7 = vshrl.u32 %v5263_v21, 16  ;;  %v926_v16 = vshrl.u32 %v5266_v56, 16 }
 0x3c0   :  { %v1405_v23 = vsel %vm1403_vm3, %v912_v45, 0  ;;  %v915_v52 = vpack.i.b16 %v914_v33, %v913_v5  ;;  %v5277_v12 = vcombine.high %v5263_v21, %v4549_v0  ;;  %v919_v15 = vshrl.u32 %v874_v18, 16 }
 0x3c1   :  { %4121 = vmatpush3.bf16.msra.mxu0 %v1405_v23  ;;  %v918_v24 = vpack.i.b16 %v908_v25, %v874_v18  ;;  %v920_v59 = vshrl.u32 %v908_v25, 16  ;;  %v5279_v42 = vpack.i.b16 %v926_v16, %v925_v7  ;;  %v5285_v39 = vcombine.high %v5266_v56, %v4549_v0 }
 0x3c2   :  { %v1451_v2 = vsel %vm1403_vm3, %v915_v52, 0  ;;  %4132 = vmatprep.subr.bf16.mxu0 %v5754_v49  ;;  %v5288_v53 = vrot.slane %v2631_v41, %v4725_v57  ;;  %v5291_v51 = vrot.slane %v2665_v20, %v4725_v57  ;;  %v931_v36 = vshrl.u32 %v5277_v12, 16 }
 0x3c3   :  { %4127 = vmatpush3.bf16.msra.mxu1 %v1451_v2  ;;  %v921_v61 = vpack.i.b16 %v920_v59, %v919_v15  ;;  %v930_v35 = vpack.i.b16 %v5285_v39, %v5277_v12  ;;  %v932_v47 = vshrl.u32 %v5285_v39, 16  ;;  %v5313_v4 = vrot.slane %v2632_v26, %v4725_v57 }
 0x3c4   :  { %4138 = vmatprep.subr.bf16.mxu1 %v5754_v49  ;;  %v5300_v43 = vcombine.high %v5288_v53, %v4549_v0  ;;  %v2685_v40 = vpack.i.b16 %v5291_v51, %v5288_v53  ;;  %v2686_v37 = vshrl.u32 %v5288_v53, 16  ;;  %v2687_v38 = vshrl.u32 %v5291_v51, 16 }
 0x3c5   :  { %v5308_v6 = vcombine.high %v5291_v51, %v4549_v0  ;;  %v5310_v34 = vpack.i.b16 %v932_v47, %v931_v36  ;;  %v5322_v5 = vrot.slane %v2666_v14, %v4725_v57  ;;  %v5326_v33 = vcombine.high %v5313_v4, %v4549_v0 }
 0x3c6   :  { %v5315_v54 = vpack.i.b16 %v2687_v38, %v2686_v37  ;;  %v2692_v20 = vshrl.u32 %v5300_v43, 16  ;;  %v2698_v25 = vshrl.u32 %v5313_v4, 16  ;;  %v1497_v38 = vsel %vm1403_vm3, %v918_v24, 0 }
 0x3c7   :  { %v2691_v41 = vpack.i.b16 %v5308_v6, %v5300_v43  ;;  %v2693_v45 = vshrl.u32 %v5308_v6, 16  ;;  %v2697_v26 = vpack.i.b16 %v5322_v5, %v5313_v4  ;;  %v2699_v7 = vshrl.u32 %v5322_v5, 16 }
 0x3c8   :  { %v5336_v16 = vcombine.high %v5322_v5, %v4549_v0  ;;  %v2704_v52 = vshrl.u32 %v5326_v33, 16  ;;  %v1635_v21 = vsel %vm1403_vm3, %v5279_v42, 0 }
 0x3c9   :  { %v5328_v18 = vpack.i.b16 %v2693_v45, %v2692_v20  ;;  %v5338_v23 = vpack.i.b16 %v2699_v7, %v2698_v25 }
 0x3ca   :  { %v2703_v14 = vpack.i.b16 %v5336_v16, %v5326_v33  ;;  %v2705_v15 = vshrl.u32 %v5336_v16, 16 }
 0x3cb   :  { %v3313_v43 = vsel %vm1403_vm3, %v5328_v18, 0 }
 0x3cc   :  { %v5344_v59 = vpack.i.b16 %v2705_v15, %v2704_v52  ;;  %v1543_v15 = vsel %vm1403_vm3, %v921_v61, 0  ;;  %v1589_v61 = vsel %vm1403_vm3, %v924_v62, 0 }
 0x410   :  { %v1354_v2 = vpop.xlane.xlu1 %1353 }
 0x411   :  { %4352 = vrcp.f32 %v1354_v2 }
 0x418   :  { %v1357_v36 = vpop.xlane.xlu0 %1356 }
 0x419   :  { %4354 = vrcp.f32 %v1357_v36 }
 0x41b   :  { %v4353_v47 = vpop.eup %4352 }
 0x41c   :  { %v1384_v37 = vmul.f32 %v4353_v47, %v5177_v3 }
 0x41e   :  { %v1392_v0 = vpack.c.bf16 %v1384_v37, %v1384_v37 }
 0x420   :  { %4123 = vmatmul.mubr.msk.bf16.vlgmr.msra.gmra.mrb[12].mxu0 %vm1303_vm2, %v1392_v0  ;;  %v1360_v20 = vpop.xlane.xlu0 %1359 }
 0x421   :  { %4133 = vmatpush3.bf16.msra.mxu0 %v1497_v38  ;;  %4134 = vmatprep.mubr.msk.bf16.mxu0 %vm4558_vm0, %v5754_v49  ;;  %4356 = vrcp.f32 %v1360_v20 }
 0x422   :  { %4144 = vmatprep.subr.bf16.mxu0 %v5754_v49 }
 0x423   :  { %v4355_v45 = vpop.eup %4354 }
 0x424   :  { %v1385_v25 = vmul.f32 %v4355_v45, %v5183_v55  ;;  %v1366_v7 = vpop.xlane.xlu0 %1365 }
 0x425   :  { %4358 = vrcp.f32 %v1366_v7 }
 0x426   :  { %v1393_v52 = vpack.c.bf16 %v1385_v25, %v1385_v25 }
 0x428   :  { %v1363_v3 = vpop.xlane.xlu1 %1362  ;;  %4129 = vmatmul.mubr.msk.bf16.vlgmr.msra.gmra.mrb[28].mxu1 %vm1303_vm2, %v1393_v52  ;;  %v1372_v24 = vpop.xlane.xlu0 %1371 }
 0x429   :  { %4360 = vrcp.f32 %v1363_v3  ;;  %4139 = vmatpush3.bf16.msra.mxu1 %v1543_v15  ;;  %4140 = vmatprep.mubr.msk.bf16.mxu1 %vm4558_vm0, %v5754_v49  ;;  %v5757_v3 = vpack.i.b16 %v5038_v48, %v5023_v29  ;;  %v5759_v29 = vpack.i.b16 %v5018_v31, %v5026_v10  ;;  %v5760_v31 = vld [vmem:[#allocation17_spill] sm:$0xff]  ;;  %v5761_v10 = vld [vmem:[#allocation16_spill] sm:$0xff] }
 0x42a   :  { %4150 = vmatprep.subr.bf16.mxu1 %v5754_v49  ;;  %4362 = vrcp.f32 %v1372_v24 }
 0x42b   :  { %v4357_v2 = vpop.eup %4356  ;;  %v2803_v15 = vsel %vm934_vm1, %v5757_v3, 0  ;;  %v2895_v48 = vsel %vm934_vm1, %v5759_v29, 0 }
 0x42c   :  { %v1386_v36 = vmul.f32 %v4357_v2, %v5189_v58  ;;  %v5768_v2 = vld [vmem:[#allocation21_spill] sm:$0xff] }
 0x42e   :  { %v1394_v55 = vpack.c.bf16 %v1386_v36, %v1386_v36  ;;  %v5769_v36 = vld [vmem:[#allocation20_spill] sm:$0xff] }
 0x42f   :  { %v4359_v47 = vpop.eup %4358 }
 0x430   :  { %v1369_v37 = vpop.xlane.xlu1 %1368  ;;  %4135 = vmatmul.mubr.msk.bf16.vlgmr.msra.gmra.mrb[16].mxu0 %vm1303_vm2, %v1394_v55  ;;  %v1388_v38 = vmul.f32 %v4359_v47, %v5193_v8  ;;  %v1681_v8 = vsel %vm1403_vm3, %v930_v35, 0  ;;  %v1727_v35 = vsel %vm1403_vm3, %v5310_v34, 0  ;;  %v5770_v55 = vpack.i.b16 %v5768_v2, %v5769_v36 }
 0x431   :  { %4364 = vrcp.f32 %v1369_v37  ;;  %4145 = vmatpush3.bf16.msra.mxu0 %v1589_v61  ;;  %4146 = vmatprep.mubr.msk.bf16.mxu0 %vm4558_vm0, %v5754_v49  ;;  %v3175_v47 = vsel %vm1403_vm3, %v2685_v40, 0  ;;  %v5771_v37 = vld [vmem:[#allocation24_spill] sm:$0xff]  ;;  %v3221_v61 = vsel %vm1403_vm3, %v5315_v54, 0 }
 0x432   :  { %4156 = vmatprep.subr.bf16.mxu0 %v5754_v49  ;;  %v1396_v45 = vpack.c.bf16 %v1388_v38, %v1388_v38 }
 0x433   :  { %v4361_v0 = vpop.eup %4360 }
 0x434   :  { %v1387_v58 = vmul.f32 %v4361_v0, %v5199_v63  ;;  %v4363_v25 = vpop.eup %4362 }
 0x435   :  { %v1390_v62 = vmul.f32 %v4363_v25, %v5197_v22  ;;  %v5755_v22 = vpack.i.b16 %v5008_v13, %v5004_v50  ;;  %v2757_v50 = vsel %vm934_vm1, %v5055_v46, 0  ;;  %v5756_v13 = vpack.i.b16 %v5011_v30, %v4996_v17  ;;  %v5763_v46 = vld [vmem:[#allocation19_spill] sm:$0xff] }
 0x436   :  { %v1395_v20 = vpack.c.bf16 %v1387_v58, %v1387_v58  ;;  %v2849_v17 = vsel %vm934_vm1, %v5069_v11, 0  ;;  %v5758_v30 = vpack.i.b16 %v5045_v28, %v5015_v32  ;;  %v2941_v32 = vsel %vm934_vm1, %v5090_v60, 0  ;;  %v5767_v60 = vld [vmem:[#allocation23_spill] sm:$0xff] }
 0x437   :  { %v1398_v39 = vpack.c.bf16 %v1390_v62, %v1390_v62  ;;  %v2711_v7 = vsel %vm934_vm1, %v5755_v22, 0  ;;  %v5762_v28 = vpack.i.b16 %v5760_v31, %v5761_v10  ;;  %v3033_v24 = vsel %vm934_vm1, %v5767_v60, 0 }
 0x438   :  { %4141 = vmatmul.mubr.msk.bf16.vlgmr.msra.gmra.mrb[32].mxu1 %vm1303_vm2, %v1395_v20  ;;  %v1375_v56 = vpop.xlane.xlu1 %1374  ;;  %4147 = vmatmul.mubr.msk.bf16.vlgmr.msra.gmra.mrb[20].mxu0 %vm1303_vm2, %v1396_v45 }
 0x439   :  { %4151 = vmatpush3.bf16.msra.mxu1 %v1635_v21  ;;  %4366 = vrcp.f32 %v1375_v56  ;;  %4157 = vmatpush3.bf16.msra.mxu0 %v1681_v8 }
 0x43a   :  { %4152 = vmatprep.mubr.msk.bf16.mxu1 %vm4558_vm0, %v5754_v49  ;;  %4158 = vmatprep.mubr.msk.bf16.mxu0 %vm4558_vm0, %v5754_v49 }
 0x43b   :  { %v4365_v63 = vpop.eup %4364  ;;  %4162 = vmatprep.subr.bf16.mxu1 %v5754_v49  ;;  %4168 = vmatprep.subr.bf16.mxu0 %v5754_v49 }
 0x43c   :  { %v1389_v42 = vmul.f32 %v4365_v63, %v5208_v1 }
 0x43e   :  { %v1397_v12 = vpack.c.bf16 %v1389_v42, %v1389_v42 }
 0x440   :  { %4153 = vmatmul.mubr.msk.bf16.vlgmr.msra.gmra.mrb[36].mxu1 %vm1303_vm2, %v1397_v12  ;;  %4159 = vmatmul.mubr.msk.bf16.vlgmr.msra.gmra.mrb[24].mxu0 %vm1303_vm2, %v1398_v39 }
 0x441   :  { %4163 = vmatpush3.bf16.msra.mxu1 %v1727_v35  ;;  %4164 = vmatprep.mubr.msk.bf16.mxu1 %vm4558_vm0, %v5754_v49 }
 0x442   :  { %4170 = vmatprep.mubr.msk.bf16.mxu0 %vm4558_vm0, %v5754_v49  ;;  %4169 = vmatpush3.bf16.xpose.msra.mxu0 %v2711_v7 }
 0x443   :  { %4174 = vmatprep.subr.bf16.mxu1 %v5754_v49  ;;  %v4367_v1 = vpop.eup %4366  ;;  %4180 = vmatprep.subr.bf16.mxu0 %v5754_v49 }
 0x444   :  { %v1391_v34 = vmul.f32 %v4367_v1, %v5226_v19 }
 0x446   :  { %v1399_v52 = vpack.c.bf16 %v1391_v34, %v1391_v34 }
 0x448   :  { %4165 = vmatmul.mubr.msk.bf16.vlgmr.msra.gmra.mrb[40].mxu1 %vm1303_vm2, %v1399_v52 }
 0x449   :  { %4171 = vmatmul.mubr.msk.bf16.vlgmr.msra.gmra.mrb[28].mxu0 %vm934_vm1, %v5756_v13  ;;  %4176 = vmatprep.mubr.msk.bf16.mxu1 %vm4558_vm0, %v5754_v49 }
 0x44a   :  { %4175 = vmatpush3.bf16.xpose.msra.mxu1 %v2757_v50  ;;  %4181 = vmatpush3.bf16.xpose.msra.mxu0 %v2803_v15 }
 0x44b   :  { %4182 = vmatprep.mubr.msk.bf16.mxu0 %vm4558_vm0, %v5754_v49  ;;  %4186 = vmatprep.subr.bf16.mxu1 %v5754_v49 }
 0x44c   :  { %4192 = vmatprep.subr.bf16.mxu0 %v5754_v49 }
 0x451   :  { %4177 = vmatmul.mubr.msk.bf16.vlgmr.msra.gmra.mrb[44].mxu1 %vm934_vm1, %v5061_v9  ;;  %4183 = vmatmul.mubr.msk.bf16.vlgmr.msra.gmra.mrb[32].mxu0 %vm934_vm1, %v5758_v30  ;;  %v5764_v9 = vld [vmem:[#allocation18_spill] sm:$0xff] }
 0x452   :  { %4187 = vmatpush3.bf16.xpose.msra.mxu1 %v2849_v17  ;;  %4193 = vmatpush3.bf16.xpose.msra.mxu0 %v2895_v48  ;;  %v5765_v11 = vpack.i.b16 %v5763_v46, %v5764_v9 }
 0x453   :  { %4188 = vmatprep.mubr.msk.bf16.mxu1 %vm4558_vm0, %v5754_v49  ;;  %4194 = vmatprep.mubr.msk.bf16.mxu0 %vm4558_vm0, %v5754_v49 }
 0x454   :  { %4198 = vmatprep.subr.bf16.mxu1 %v5754_v49  ;;  %4204 = vmatprep.subr.bf16.mxu0 %v5754_v49  ;;  %v2987_v19 = vsel %vm934_vm1, %v5765_v11, 0 }
 0x459   :  { %4189 = vmatmul.mubr.msk.bf16.vlgmr.msra.gmra.mrb[48].mxu1 %vm934_vm1, %v5074_v27  ;;  %4195 = vmatmul.mubr.msk.bf16.vlgmr.msra.gmra.mrb[36].mxu0 %vm934_vm1, %v5762_v28  ;;  %v5766_v27 = vld [vmem:[#allocation22_spill] sm:$0xff] }
 0x45a   :  { %4199 = vmatpush3.bf16.xpose.msra.mxu1 %v2941_v32  ;;  %4205 = vmatpush3.bf16.xpose.msra.mxu0 %v2987_v19 }
 0x45b   :  { %4200 = vmatprep.mubr.msk.bf16.mxu1 %vm4558_vm0, %v5754_v49  ;;  %4206 = vmatprep.mubr.msk.bf16.mxu0 %vm4558_vm0, %v5754_v49 }
 0x45c   :  { %4210 = vmatprep.subr.bf16.mxu1 %v5754_v49  ;;  %4216 = vmatprep.subr.bf16.mxu0 %v5754_v49 }
 0x461   :  { %4201 = vmatmul.mubr.msk.bf16.vlgmr.msra.gmra.mrb[52].mxu1 %vm934_vm1, %v5766_v27  ;;  %4207 = vmatmul.mubr.msk.bf16.vlgmr.msra.gmra.mrb[40].mxu0 %vm934_vm1, %v5770_v55 }
 0x462   :  { %4211 = vmatpush3.bf16.xpose.msra.mxu1 %v3033_v24  ;;  %4217 = vmatpush3.bf16.msra.mxu0 %v3175_v47 }
 0x463   :  { %4212 = vmatprep.mubr.msk.bf16.mxu1 %vm4558_vm0, %v5754_v49  ;;  %4222 = vmatprep.subr.bf16.mxu1 %v5754_v49 }
 0x464   :  { %4218 = vmatprep.mubr.msk.bf16.mxu0 %vm4558_vm0, %v5754_v49  ;;  %4228 = vmatprep.subr.bf16.mxu0 %v5754_v49 }
 0x469   :  { %4213 = vmatmul.mubr.msk.bf16.vlgmr.msra.gmra.mrb[56].mxu1 %vm934_vm1, %v5771_v37 }
 0x46a   :  { %4223 = vmatpush3.bf16.msra.mxu1 %v3221_v61  ;;  %4224 = vmatprep.mubr.msk.bf16.mxu1 %vm4558_vm0, %v5754_v49 }
 0x46b   :  { %4234 = vmatprep.subr.bf16.mxu1 %v5754_v49 }
 0x4f3   :  { %v1441_v53 = vpop.f32.mrb[12].mxu0 }
 0x4f4   :  { %v4124_v51 = vpop.f32.mrb[13].mxu0 }
 0x4f5   :  { %v1444_v40 = vpop.f32.mrb[14].mxu0 }
 0x4f6   :  { %v4125_v0 = vpop.f32.mrb[15].mxu0 }
 0x4fb   :  { %v1487_v38 = vpop.f32.mrb[28].mxu1 }
 0x4fc   :  { %v4130_v58 = vpop.f32.mrb[29].mxu1 }
 0x4fd   :  { %v1490_v20 = vpop.f32.mrb[30].mxu1 }
 0x4fe   :  { %v4131_v45 = vpop.f32.mrb[31].mxu1 }
 0x503   :  { %v1533_v25 = vpop.f32.mrb[16].mxu0 }
 0x504   :  { %v1769_v21 = vcombine.low %v1441_v53, %v1533_v25  ;;  %v1770_v56 = vcombine.high %v1441_v53, %v1533_v25  ;;  %v4136_v8 = vpop.f32.mrb[17].mxu0 }
 0x505   :  { %v1536_v63 = vpop.f32.mrb[18].mxu0 }
 0x506   :  { %v4137_v54 = vpop.f32.mrb[19].mxu0  ;;  %v1777_v1 = vrot.slane %v1769_v21, %v4721_v44  ;;  %v1784_v34 = vrot.slane %v1770_v56, %v4721_v44 }
 0x50b   :  { %v1579_v62 = vpop.f32.mrb[32].mxu1  ;;  %v1625_v39 = vpop.f32.mrb[20].mxu0 }
 0x50c   :  { %v1785_v42 = vcombine.low %v1487_v38, %v1579_v62  ;;  %v1786_v12 = vcombine.high %v1487_v38, %v1579_v62  ;;  %v4142_v35 = vpop.f32.mrb[33].mxu1  ;;  %v4148_v22 = vpop.f32.mrb[21].mxu0 }
 0x50d   :  { %v1582_v7 = vpop.f32.mrb[34].mxu1  ;;  %v1628_v13 = vpop.f32.mrb[22].mxu0 }
 0x50e   :  { %v1793_v52 = vrot.slane %v1785_v42, %v4721_v44  ;;  %v1800_v50 = vrot.slane %v1786_v12, %v4721_v44  ;;  %v4143_v3 = vpop.f32.mrb[35].mxu1  ;;  %v4149_v15 = vpop.f32.mrb[23].mxu0 }
 0x510   :  { %v1833_v17 = vcombine.low %v1777_v1, %v1793_v52  ;;  %v1834_v30 = vcombine.high %v1777_v1, %v1793_v52  ;;  %v1849_v29 = vcombine.low %v1784_v34, %v1800_v50  ;;  %v1850_v48 = vcombine.high %v1784_v34, %v1800_v50 }
 0x512   :  { %v1841_v32 = vrot.slane %v1833_v17, %v4725_v57  ;;  %v1848_v31 = vrot.slane %v1834_v30, %v4725_v57  ;;  %v1857_v10 = vrot.slane %v1849_v29, %v4725_v57  ;;  %v1864_v28 = vrot.slane %v1850_v48, %v4725_v57 }
 0x513   :  { %v1671_v46 = vpop.f32.mrb[36].mxu1  ;;  %v1717_v60 = vpop.f32.mrb[24].mxu0 }
 0x514   :  { %v3937_v9 = vcombine.low %v1841_v32, %v1848_v31  ;;  %v3939_v11 = vcombine.high %v1841_v32, %v1848_v31  ;;  %v3941_v19 = vcombine.low %v1857_v10, %v1864_v28  ;;  %v3943_v27 = vcombine.high %v1857_v10, %v1864_v28  ;;  %v4154_v24 = vpop.f32.mrb[37].mxu1  ;;  %v4160_v55 = vpop.f32.mrb[25].mxu0 }
 0x515   :  { %v1801_v2 = vcombine.low %v1625_v39, %v1717_v60  ;;  %v1802_v36 = vcombine.high %v1625_v39, %v1717_v60  ;;  %v1674_v47 = vpop.f32.mrb[38].mxu1  ;;  %v1720_v40 = vpop.f32.mrb[26].mxu0 }
 0x516   :  { %v1913_v37 = vrot.slane %v3937_v9, %v4721_v44  ;;  %v1929_v61 = vrot.slane %v3939_v11, %v4721_v44  ;;  %v1945_v53 = vrot.slane %v3941_v19, %v4721_v44  ;;  %v1961_v51 = vrot.slane %v3943_v27, %v4721_v44  ;;  %v4155_v0 = vpop.f32.mrb[39].mxu1  ;;  %v4161_v38 = vpop.f32.mrb[27].mxu0 }
 0x517   :  { %v1809_v13 = vrot.slane %v1801_v2, %v4721_v44  ;;  %v1816_v3 = vrot.slane %v1802_v36, %v4721_v44 }
 0x518   :  { %v1970_v58 = vcombine.high %v1913_v37, %v1929_v61  ;;  %v2002_v20 = vcombine.high %v1945_v53, %v1961_v51  ;;  %v1969_v45 = vcombine.low %v1913_v37, %v1929_v61  ;;  %v2001_v25 = vcombine.low %v1945_v53, %v1961_v51 }
 0x51a   :  { %v5491_v21 = vrot.slane %v1970_v58, %v4725_v57  ;;  %v5494_v56 = vrot.slane %v2002_v20, %v4725_v57  ;;  %v5497_v8 = vrot.slane %v1969_v45, %v4725_v57  ;;  %v5500_v63 = vrot.slane %v2001_v25, %v4725_v57 }
 0x51b   :  { %v1763_v54 = vpop.f32.mrb[40].mxu1 }
 0x51c   :  { %v2035_v62 = vcombine.low %v5491_v21, %v5494_v56  ;;  %v2033_v42 = vcombine.low %v5497_v8, %v5500_v63  ;;  %v2034_v12 = vcombine.high %v5497_v8, %v5500_v63  ;;  %v2036_v39 = vcombine.high %v5491_v21, %v5494_v56  ;;  %v5510_v7 = vpop.f32.mrb[28].mxu0  ;;  %v4166_v1 = vpop.f32.mrb[41].mxu1 }
 0x51d   :  { %v1817_v35 = vcombine.low %v1671_v46, %v1763_v54  ;;  %v1818_v22 = vcombine.high %v1671_v46, %v1763_v54  ;;  %v4172_v34 = vpop.f32.mrb[29].mxu0  ;;  %v1766_v52 = vpop.f32.mrb[42].mxu1  ;;  %v3075_v50 = vsel %vm1303_vm2, %v5510_v7, -inf }
 0x51e   :  { %3076 = vmax.xlane.f32.xlu0 %v3075_v50  ;;  %v2750_v30 = vpop.f32.mrb[30].mxu0  ;;  %v4167_v29 = vpop.f32.mrb[43].mxu1 }
 0x51f   :  { %v1825_v15 = vrot.slane %v1817_v35, %v4721_v44  ;;  %v1832_v17 = vrot.slane %v1818_v22, %v4721_v44  ;;  %v4173_v48 = vpop.f32.mrb[31].mxu0 }
 0x521   :  { %v1865_v32 = vcombine.low %v1809_v13, %v1825_v15  ;;  %v1866_v31 = vcombine.high %v1809_v13, %v1825_v15  ;;  %v1881_v10 = vcombine.low %v1816_v3, %v1832_v17  ;;  %v1882_v28 = vcombine.high %v1816_v3, %v1832_v17 }
 0x523   :  { %v1873_v46 = vrot.slane %v1865_v32, %v4725_v57  ;;  %v1880_v9 = vrot.slane %v1866_v31, %v4725_v57  ;;  %v1889_v11 = vrot.slane %v1881_v10, %v4725_v57  ;;  %v1896_v19 = vrot.slane %v1882_v28, %v4725_v57 }
 0x524   :  { %v5522_v27 = vpop.f32.mrb[44].mxu1  ;;  %v5524_v55 = vpop.f32.mrb[32].mxu0 }
 0x525   :  { %v3938_v60 = vcombine.low %v1873_v46, %v1880_v9  ;;  %v3940_v24 = vcombine.high %v1873_v46, %v1880_v9  ;;  %v3942_v2 = vcombine.low %v1889_v11, %v1896_v19  ;;  %v3944_v36 = vcombine.high %v1889_v11, %v1896_v19  ;;  %v4178_v47 = vpop.f32.mrb[45].mxu1  ;;  %v4184_v37 = vpop.f32.mrb[33].mxu0 }
 0x526   :  { %v3078_v61 = vsel %vm1303_vm2, %v5522_v27, -inf  ;;  %v2796_v53 = vpop.f32.mrb[46].mxu1  ;;  %v3081_v51 = vsel %vm1303_vm2, %v5524_v55, -inf  ;;  %v2842_v20 = vpop.f32.mrb[34].mxu0 }
 0x527   :  { %v1920_v40 = vrot.slane %v3938_v60, %v4721_v44  ;;  %v1936_v0 = vrot.slane %v3940_v24, %v4721_v44  ;;  %v1952_v38 = vrot.slane %v3942_v2, %v4721_v44  ;;  %v1968_v58 = vrot.slane %v3944_v36, %v4721_v44  ;;  %3079 = vmax.xlane.f32.xlu1 %v3078_v61  ;;  %v4179_v45 = vpop.f32.mrb[47].mxu1  ;;  %v4185_v25 = vpop.f32.mrb[35].mxu0 }
 0x528   :  { %3082 = vmax.xlane.f32.xlu0 %v3081_v51 }
 0x529   :  { %v1985_v54 = vcombine.low %v1920_v40, %v1936_v0  ;;  %v2017_v35 = vcombine.low %v1952_v38, %v1968_v58  ;;  %v1986_v22 = vcombine.high %v1920_v40, %v1936_v0  ;;  %v2018_v1 = vcombine.high %v1952_v38, %v1968_v58 }
 0x52b   :  { %v5535_v34 = vrot.slane %v1985_v54, %v4725_v57  ;;  %v5538_v52 = vrot.slane %v2017_v35, %v4725_v57  ;;  %v5541_v50 = vrot.slane %v1986_v22, %v4725_v57  ;;  %v5544_v13 = vrot.slane %v2018_v1, %v4725_v57 }
 0x52c   :  { %v2885_v3 = vpop.f32.mrb[48].mxu1  ;;  %v2931_v15 = vpop.f32.mrb[36].mxu0 }
 0x52d   :  { %v4190_v17 = vpop.f32.mrb[49].mxu1  ;;  %v3084_v30 = vsel %vm1303_vm2, %v2885_v3, -inf  ;;  %v2038_v29 = vcombine.high %v5535_v34, %v5538_v52  ;;  %v2037_v48 = vcombine.low %v5535_v34, %v5538_v52  ;;  %v2039_v32 = vcombine.low %v5541_v50, %v5544_v13  ;;  %v4196_v31 = vpop.f32.mrb[37].mxu0 }
 0x52e   :  { %3085 = vmax.xlane.f32.xlu1 %v3084_v30  ;;  %v2888_v10 = vpop.f32.mrb[50].mxu1  ;;  %v3087_v28 = vsel %vm1303_vm2, %v2931_v15, -inf  ;;  %v2040_v46 = vcombine.high %v5541_v50, %v5544_v13  ;;  %v2934_v9 = vpop.f32.mrb[38].mxu0 }
 0x52f   :  { %3088 = vmax.xlane.f32.xlu0 %v3087_v28  ;;  %v4191_v11 = vpop.f32.mrb[51].mxu1  ;;  %v4197_v19 = vpop.f32.mrb[39].mxu0 }
 0x534   :  { %v2977_v60 = vpop.f32.mrb[52].mxu1  ;;  %v3023_v24 = vpop.f32.mrb[40].mxu0 }
 0x535   :  { %v4202_v2 = vpop.f32.mrb[53].mxu1  ;;  %v3090_v36 = vsel %vm1303_vm2, %v2977_v60, -inf  ;;  %v4208_v47 = vpop.f32.mrb[41].mxu0  ;;  %v3093_v61 = vsel %vm1303_vm2, %v3023_v24, -inf }
 0x536   :  { %3091 = vmax.xlane.f32.xlu1 %v3090_v36  ;;  %v2980_v37 = vpop.f32.mrb[54].mxu1  ;;  %3094 = vmax.xlane.f32.xlu0 %v3093_v61  ;;  %v3026_v53 = vpop.f32.mrb[42].mxu0 }
 0x537   :  { %v4203_v51 = vpop.f32.mrb[55].mxu1  ;;  %v4209_v40 = vpop.f32.mrb[43].mxu0 }
 0x53c   :  { %v3069_v0 = vpop.f32.mrb[56].mxu1 }
 0x53d   :  { %v4214_v38 = vpop.f32.mrb[57].mxu1  ;;  %v3096_v58 = vsel %vm1303_vm2, %v3069_v0, -inf }
 0x53e   :  { %3097 = vmax.xlane.f32.xlu1 %v3096_v58  ;;  %v3072_v20 = vpop.f32.mrb[58].mxu1 }
 0x53f   :  { %v4215_v45 = vpop.f32.mrb[59].mxu1 }
 0x5ab   :  { %v3077_v25 = vpop.xlane.xlu0 %3076 }
 0x5ac   :  { %v3099_v54 = vsub.f32 %v5510_v7, %v3077_v25 }
 0x5ae   :  { %v3107_v35 = vmul.f32 1.442695, %v3099_v54 }
 0x5b0   :  { %4368 = vpow2.f32 %v3107_v35 }
 0x5b4   :  { %v3080_v22 = vpop.xlane.xlu1 %3079 }
 0x5b5   :  { %v3100_v1 = vsub.f32 %v5522_v27, %v3080_v22  ;;  %v3083_v17 = vpop.xlane.xlu0 %3082 }
 0x5b6   :  { %v3101_v30 = vsub.f32 %v5524_v55, %v3083_v17 }
 0x5b7   :  { %v3109_v31 = vmul.f32 1.442695, %v3100_v1 }
 0x5b8   :  { %v3111_v10 = vmul.f32 1.442695, %v3101_v30 }
 0x5b9   :  { %4370 = vpow2.f32 %v3109_v31 }
 0x5ba   :  { %4372 = vpow2.f32 %v3111_v10  ;;  %v4369_v28 = vpop.eup %4368 }
 0x5bb   :  { %v3086_v9 = vpop.xlane.xlu1 %3085  ;;  %v3123_v2 = vsel %vm1303_vm2, %v4369_v28, 0.0 }
 0x5bc   :  { %v3102_v11 = vsub.f32 %v2885_v3, %v3086_v9  ;;  %v3089_v19 = vpop.xlane.xlu0 %3088  ;;  %3124 = vadd.xlane.f32.xlu0 %v3123_v2 }
 0x5bd   :  { %v3103_v36 = vsub.f32 %v2931_v15, %v3089_v19 }
 0x5be   :  { %v3113_v7 = vmul.f32 1.442695, %v3102_v11 }
 0x5bf   :  { %v3115_v47 = vmul.f32 1.442695, %v3103_v36 }
 0x5c0   :  { %4374 = vpow2.f32 %v3113_v7  ;;  %v3267_v7 = vsel %vm1403_vm3, %v2691_v41, 0  ;;  %v3359_v41 = vsel %vm1403_vm3, %v2697_v26, 0  ;;  %v3405_v26 = vsel %vm1403_vm3, %v5338_v23, 0 }
 0x5c1   :  { %4376 = vpow2.f32 %v3115_v47 }
 0x5c3   :  { %v4371_v27 = vpop.eup %4370  ;;  %v3092_v37 = vpop.xlane.xlu1 %3091 }
 0x5c4   :  { %v4373_v61 = vpop.eup %4372  ;;  %v3104_v55 = vsub.f32 %v2977_v60, %v3092_v37  ;;  %v3095_v53 = vpop.xlane.xlu0 %3094  ;;  %v3126_v51 = vsel %vm1303_vm2, %v4371_v27, 0.0 }
 0x5c5   :  { %v3105_v40 = vsub.f32 %v3023_v24, %v3095_v53  ;;  %3127 = vadd.xlane.f32.xlu1 %v3126_v51  ;;  %v3129_v3 = vsel %vm1303_vm2, %v4373_v61, 0.0 }
 0x5c6   :  { %v3117_v38 = vmul.f32 1.442695, %v3104_v55  ;;  %3130 = vadd.xlane.f32.xlu0 %v3129_v3 }
 0x5c7   :  { %v3119_v58 = vmul.f32 1.442695, %v3105_v40 }
 0x5c8   :  { %4378 = vpow2.f32 %v3117_v38 }
 0x5c9   :  { %4380 = vpow2.f32 %v3119_v58 }
 0x5ca   :  { %v4375_v15 = vpop.eup %4374 }
 0x5cb   :  { %v4377_v20 = vpop.eup %4376  ;;  %v3098_v45 = vpop.xlane.xlu1 %3097  ;;  %v3132_v25 = vsel %vm1303_vm2, %v4375_v15, 0.0 }
 0x5cc   :  { %v3106_v54 = vsub.f32 %v3069_v0, %v3098_v45  ;;  %3133 = vadd.xlane.f32.xlu1 %v3132_v25  ;;  %v3135_v60 = vsel %vm1303_vm2, %v4377_v20, 0.0 }
 0x5cd   :  { %3136 = vadd.xlane.f32.xlu0 %v3135_v60 }
 0x5ce   :  { %v3121_v35 = vmul.f32 1.442695, %v3106_v54 }
 0x5d0   :  { %4382 = vpow2.f32 %v3121_v35 }
 0x5d2   :  { %v5567_v24 = vpop.eup %4378 }
 0x5d3   :  { %v5569_v22 = vpop.eup %4380  ;;  %v3138_v1 = vsel %vm1303_vm2, %v5567_v24, 0.0 }
 0x5d4   :  { %3139 = vadd.xlane.f32.xlu1 %v3138_v1  ;;  %v3141_v17 = vsel %vm1303_vm2, %v5569_v22, 0.0 }
 0x5d5   :  { %3142 = vadd.xlane.f32.xlu0 %v3141_v17 }
 0x5da   :  { %v5575_v30 = vpop.eup %4382 }
 0x5db   :  { %v3144_v0 = vsel %vm1303_vm2, %v5575_v30, 0.0 }
 0x5dc   :  { %3145 = vadd.xlane.f32.xlu1 %v3144_v0 }
 0x649   :  { %v3125_v31 = vpop.xlane.xlu0 %3124 }
 0x64a   :  { %4384 = vrcp.f32 %v3125_v31 }
 0x652   :  { %v3128_v10 = vpop.xlane.xlu1 %3127 }
 0x653   :  { %4386 = vrcp.f32 %v3128_v10  ;;  %v3131_v9 = vpop.xlane.xlu0 %3130 }
 0x654   :  { %4388 = vrcp.f32 %v3131_v9  ;;  %v4385_v11 = vpop.eup %4384 }
 0x655   :  { %v3155_v19 = vmul.f32 %v4385_v11, %v4369_v28 }
 0x657   :  { %v3163_v2 = vpack.c.bf16 %v3155_v19, %v3155_v19 }
 0x659   :  { %v3134_v36 = vpop.xlane.xlu1 %3133  ;;  %4219 = vmatmul.mubr.msk.bf16.vlgmr.msra.gmra.mrb[44].mxu0 %vm1303_vm2, %v3163_v2 }
 0x65a   :  { %4390 = vrcp.f32 %v3134_v36  ;;  %v3137_v47 = vpop.xlane.xlu0 %3136  ;;  %4229 = vmatpush3.bf16.msra.mxu0 %v3267_v7  ;;  %4230 = vmatprep.mubr.msk.bf16.mxu0 %vm4558_vm0, %v5754_v49 }
 0x65b   :  { %4392 = vrcp.f32 %v3137_v47  ;;  %4240 = vmatprep.subr.bf16.mxu0 %v5754_v49 }
 0x65d   :  { %v4387_v37 = vpop.eup %4386 }
 0x65e   :  { %v4389_v28 = vpop.eup %4388  ;;  %v3156_v55 = vmul.f32 %v4387_v37, %v4371_v27 }
 0x65f   :  { %v3157_v53 = vmul.f32 %v4389_v28, %v4373_v61 }
 0x660   :  { %v3164_v51 = vpack.c.bf16 %v3156_v55, %v3156_v55 }
 0x661   :  { %v3140_v40 = vpop.xlane.xlu1 %3139  ;;  %v3165_v3 = vpack.c.bf16 %v3157_v53, %v3157_v53 }
 0x662   :  { %4225 = vmatmul.mubr.msk.bf16.vlgmr.msra.gmra.mrb[60].mxu1 %vm1303_vm2, %v3164_v51  ;;  %4394 = vrcp.f32 %v3140_v40  ;;  %v3143_v6 = vpop.xlane.xlu0 %3142 }
 0x663   :  { %4235 = vmatpush3.bf16.msra.mxu1 %v3313_v43  ;;  %4231 = vmatmul.mubr.msk.bf16.vlgmr.msra.gmra.mrb[48].mxu0 %vm1303_vm2, %v3165_v3  ;;  %4396 = vrcp.f32 %v3143_v6 }
 0x664   :  { %v4391_v27 = vpop.eup %4390  ;;  %4241 = vmatpush3.bf16.msra.mxu0 %v3359_v41  ;;  %4236 = vmatprep.mubr.msk.bf16.mxu1 %vm4558_vm0, %v5754_v49 }
 0x665   :  { %v4393_v61 = vpop.eup %4392  ;;  %v3158_v38 = vmul.f32 %v4391_v27, %v4375_v15  ;;  %4242 = vmatprep.mubr.msk.bf16.mxu0 %vm4558_vm0, %v5754_v49  ;;  %4246 = vmatprep.subr.bf16.mxu1 %v5754_v49  ;;  %v3451_v15 = vsel %vm1403_vm3, %v2703_v14, 0  ;;  %v3497_v14 = vsel %vm1403_vm3, %v5344_v59, 0 }
 0x666   :  { %v3159_v18 = vmul.f32 %v4393_v61, %v4377_v20  ;;  %4252 = vmatprep.subr.bf16.mxu0 %v5754_v49 }
 0x667   :  { %v3166_v58 = vpack.c.bf16 %v3158_v38, %v3158_v38 }
 0x668   :  { %v3167_v4 = vpack.c.bf16 %v3159_v18, %v3159_v18 }
 0x669   :  { %v3146_v5 = vpop.xlane.xlu1 %3145 }
 0x66a   :  { %4237 = vmatmul.mubr.msk.bf16.vlgmr.msra.gmra.mrb[64].mxu1 %vm1303_vm2, %v3166_v58  ;;  %4398 = vrcp.f32 %v3146_v5 }
 0x66b   :  { %4247 = vmatpush3.bf16.msra.mxu1 %v3405_v26  ;;  %4243 = vmatmul.mubr.msk.bf16.vlgmr.msra.gmra.mrb[52].mxu0 %vm1303_vm2, %v3167_v4 }
 0x66c   :  { %v4395_v20 = vpop.eup %4394  ;;  %4253 = vmatpush3.bf16.msra.mxu0 %v3451_v15  ;;  %4248 = vmatprep.mubr.msk.bf16.mxu1 %vm4558_vm0, %v5754_v49 }
 0x66d   :  { %v4397_v45 = vpop.eup %4396  ;;  %v3160_v25 = vmul.f32 %v4395_v20, %v5567_v24  ;;  %4254 = vmatprep.mubr.msk.bf16.mxu0 %vm4558_vm0, %v5754_v49  ;;  %4258 = vmatprep.subr.bf16.mxu1 %v5754_v49  ;;  %v162_v24 = vld [vmem:[#allocation8] sm:$0xff] }
 0x66e   :  { %v3161_v23 = vmul.f32 %v4397_v45, %v5569_v22  ;;  %4264 = vmatprep.subr.bf16.mxu0 %v5754_v49  ;;  %v163_v22 = vld [vmem:[#allocation8 + $0x8] sm:$0xff] }
 0x66f   :  { %v3168_v33 = vpack.c.bf16 %v3160_v25, %v3160_v25  ;;  %v178_v1 = vpack.c.bf16 %v163_v22, %v162_v24 }
 0x670   :  { %v3169_v16 = vpack.c.bf16 %v3161_v23, %v3161_v23 }
 0x672   :  { %4249 = vmatmul.mubr.msk.bf16.vlgmr.msra.gmra.mrb[68].mxu1 %vm1303_vm2, %v3168_v33 }
 0x673   :  { %4255 = vmatmul.mubr.msk.bf16.vlgmr.msra.gmra.mrb[56].mxu0 %vm1303_vm2, %v3169_v16  ;;  %4259 = vmatpush3.bf16.msra.mxu1 %v3497_v14 }
 0x674   :  { %v4399_v54 = vpop.eup %4398  ;;  %4260 = vmatprep.mubr.msk.bf16.mxu1 %vm4558_vm0, %v5754_v49  ;;  %4280 = vmatprep.mubr.msk.bf16.mxu0 %vm4558_vm0, %v5754_v49 }
 0x675   :  { %v3162_v60 = vmul.f32 %v4399_v54, %v5575_v30  ;;  %4265 = vmatpush3.bf16.msra.mxu0 %v178_v1 }
 0x676   :  { %4266 = vmatprep.subr.bf16.mxu0 %v5754_v49 }
 0x677   :  { %v3170_v35 = vpack.c.bf16 %v3162_v60, %v3162_v60 }
 0x67a   :  { %4261 = vmatmul.mubr.msk.bf16.vlgmr.msra.gmra.mrb[72].mxu1 %vm1303_vm2, %v3170_v35 }
 0x72c   :  { %v3211_v59 = vpop.f32.mrb[44].mxu0 }
 0x72d   :  { %v4220_v17 = vpop.f32.mrb[45].mxu0 }
 0x72e   :  { %v3214_v0 = vpop.f32.mrb[46].mxu0 }
 0x72f   :  { %v4221_v31 = vpop.f32.mrb[47].mxu0 }
 0x735   :  { %v3257_v10 = vpop.f32.mrb[60].mxu1 }
 0x736   :  { %v3303_v9 = vpop.f32.mrb[48].mxu0  ;;  %v4226_v11 = vpop.f32.mrb[61].mxu1 }
 0x737   :  { %v3539_v19 = vcombine.low %v3211_v59, %v3303_v9  ;;  %v3540_v2 = vcombine.high %v3211_v59, %v3303_v9  ;;  %v4232_v36 = vpop.f32.mrb[49].mxu0  ;;  %v3260_v30 = vpop.f32.mrb[62].mxu1 }
 0x738   :  { %v3306_v7 = vpop.f32.mrb[50].mxu0  ;;  %v4227_v47 = vpop.f32.mrb[63].mxu1  ;;  %v165_v36 = vld [vmem:[#allocation8 + $0x18] sm:$0xff] }
 0x739   :  { %v4233_v37 = vpop.f32.mrb[51].mxu0  ;;  %v3547_v6 = vrot.slane %v3539_v19, %v4721_v44  ;;  %v3554_v41 = vrot.slane %v3540_v2, %v4721_v44  ;;  %v164_v2 = vld [vmem:[#allocation8 + $0x10] sm:$0xff] }
 0x73a   :  { %v179_v7 = vpack.c.bf16 %v165_v36, %v164_v2  ;;  %v172_v2 = vld [vmem:[#allocation8 + $0x50] sm:$0xff]  ;;  %v173_v36 = vld [vmem:[#allocation8 + $0x58] sm:$0xff] }
 0x73c   :  { %4267 = vmatpush3.bf16.msra.mxu0 %v179_v7 }
 0x73d   :  { %v3349_v28 = vpop.f32.mrb[64].mxu1  ;;  %4268 = vmatprep.subr.bf16.mxu0 %v5754_v49 }
 0x73e   :  { %v3555_v55 = vcombine.low %v3257_v10, %v3349_v28  ;;  %v3556_v53 = vcombine.high %v3257_v10, %v3349_v28  ;;  %v5628_v51 = vpop.f32.mrb[52].mxu0  ;;  %v4238_v40 = vpop.f32.mrb[65].mxu1 }
 0x73f   :  { %v4244_v3 = vpop.f32.mrb[53].mxu0  ;;  %v3352_v43 = vpop.f32.mrb[66].mxu1 }
 0x740   :  { %v3563_v27 = vrot.slane %v3555_v55, %v4721_v44  ;;  %v3570_v61 = vrot.slane %v3556_v53, %v4721_v44  ;;  %v3398_v38 = vpop.f32.mrb[54].mxu0  ;;  %v4239_v18 = vpop.f32.mrb[67].mxu1  ;;  %v166_v53 = vld [vmem:[#allocation8 + $0x20] sm:$0xff] }
 0x741   :  { %v4245_v58 = vpop.f32.mrb[55].mxu0 }
 0x742   :  { %v3603_v4 = vcombine.low %v3547_v6, %v3563_v27  ;;  %v3604_v5 = vcombine.high %v3547_v6, %v3563_v27  ;;  %v3619_v26 = vcombine.low %v3554_v41, %v3570_v61  ;;  %v3620_v15 = vcombine.high %v3554_v41, %v3570_v61  ;;  %v168_v41 = vld [vmem:[#allocation8 + $0x30] sm:$0xff]  ;;  %v169_v27 = vld [vmem:[#allocation8 + $0x38] sm:$0xff] }
 0x744   :  { %v3611_v20 = vrot.slane %v3603_v4, %v4725_v57  ;;  %v3618_v45 = vrot.slane %v3604_v5, %v4725_v57  ;;  %v3627_v25 = vrot.slane %v3619_v26, %v4725_v57  ;;  %v3634_v23 = vrot.slane %v3620_v15, %v4725_v57 }
 0x745   :  { %v3441_v33 = vpop.f32.mrb[68].mxu1 }
 0x746   :  { %v3961_v16 = vcombine.low %v3611_v20, %v3618_v45  ;;  %v3963_v14 = vcombine.high %v3611_v20, %v3618_v45  ;;  %v3965_v54 = vcombine.low %v3627_v25, %v3634_v23  ;;  %v3967_v60 = vcombine.high %v3627_v25, %v3634_v23  ;;  %v3487_v35 = vpop.f32.mrb[56].mxu0  ;;  %v4250_v24 = vpop.f32.mrb[69].mxu1 }
 0x747   :  { %v3571_v22 = vcombine.low %v5628_v51, %v3487_v35  ;;  %v3572_v1 = vcombine.high %v5628_v51, %v3487_v35  ;;  %v4256_v59 = vpop.f32.mrb[57].mxu0  ;;  %v3444_v17 = vpop.f32.mrb[70].mxu1  ;;  %v167_v51 = vld [vmem:[#allocation8 + $0x28] sm:$0xff]  ;;  %v170_v24 = vld [vmem:[#allocation8 + $0x40] sm:$0xff] }
 0x748   :  { %v3683_v0 = vrot.slane %v3961_v16, %v4721_v44  ;;  %v3699_v31 = vrot.slane %v3963_v14, %v4721_v44  ;;  %v3715_v10 = vrot.slane %v3965_v54, %v4721_v44  ;;  %v3731_v9 = vrot.slane %v3967_v60, %v4721_v44  ;;  %v3490_v11 = vpop.f32.mrb[58].mxu0  ;;  %v4251_v19 = vpop.f32.mrb[71].mxu1 }
 0x749   :  { %v4257_v30 = vpop.f32.mrb[59].mxu0  ;;  %v3579_v61 = vrot.slane %v3571_v22, %v4721_v44  ;;  %v180_v18 = vpack.c.bf16 %v167_v51, %v166_v53  ;;  %v3586_v20 = vrot.slane %v3572_v1, %v4721_v44  ;;  %v181_v16 = vpack.c.bf16 %v169_v27, %v168_v41  ;;  %v171_v22 = vld [vmem:[#allocation8 + $0x48] sm:$0xff] }
 0x74a   :  { %v3740_v47 = vcombine.high %v3683_v0, %v3699_v31  ;;  %v3772_v37 = vcombine.high %v3715_v10, %v3731_v9  ;;  %v3739_v28 = vcombine.low %v3683_v0, %v3699_v31  ;;  %v3771_v55 = vcombine.low %v3715_v10, %v3731_v9  ;;  %v175_v41 = vld [vmem:[#allocation8 + $0x68] sm:$0xff] }
 0x74b   :  { %4269 = vmatpush3.bf16.msra.mxu0 %v180_v18 }
 0x74c   :  { %v3754_v40 = vrot.slane %v3740_v47, %v4725_v57  ;;  %v3786_v3 = vrot.slane %v3772_v37, %v4725_v57  ;;  %v5647_v43 = vrot.slane %v3739_v28, %v4725_v57  ;;  %v5650_v6 = vrot.slane %v3771_v55, %v4725_v57  ;;  %4270 = vmatprep.subr.bf16.mxu0 %v5754_v49 }
 0x74d   :  { %v3533_v38 = vpop.f32.mrb[72].mxu1  ;;  %v183_v28 = vpack.c.bf16 %v173_v36, %v172_v2 }
 0x74e   :  { %v3587_v58 = vcombine.low %v3441_v33, %v3533_v38  ;;  %v3588_v4 = vcombine.high %v3441_v33, %v3533_v38  ;;  %v4262_v5 = vpop.f32.mrb[73].mxu1  ;;  %v3805_v26 = vcombine.low %v3754_v40, %v3786_v3  ;;  %v3804_v15 = vcombine.high %v5647_v43, %v5650_v6 }
 0x74f   :  { %v3536_v45 = vpop.f32.mrb[74].mxu1  ;;  %v3803_v25 = vcombine.low %v5647_v43, %v5650_v6  ;;  %v3806_v23 = vcombine.high %v3754_v40, %v3786_v3  ;;  %4271 = vmatpush3.bf16.msra.mxu0 %v181_v16  ;;  %v174_v3 = vld [vmem:[#allocation8 + $0x60] sm:$0xff] }
 0x750   :  { %v3595_v14 = vrot.slane %v3587_v58, %v4721_v44  ;;  %v3602_v54 = vrot.slane %v3588_v4, %v4721_v44  ;;  %v4263_v60 = vpop.f32.mrb[75].mxu1  ;;  %v4311_v33 = vpack.i.bf16 %v2035_v62, %v3805_v26  ;;  %v4306_v35 = vpack.i.bf16 %v2034_v12, %v3804_v15  ;;  %4272 = vmatprep.subr.bf16.mxu0 %v5754_v49  ;;  %v176_v15 = vld [vmem:[#allocation8 + $0x70] sm:$0xff] }
 0x751   :  { %v4316_v1 = vpack.i.bf16 %v2036_v39, %v3806_v23  ;;  %v182_v62 = vpack.c.bf16 %v171_v22, %v170_v24 }
 0x752   :  { %v3635_v59 = vcombine.low %v3579_v61, %v3595_v14  ;;  %v3636_v17 = vcombine.high %v3579_v61, %v3595_v14  ;;  %v3651_v0 = vcombine.low %v3586_v20, %v3602_v54  ;;  %v3652_v31 = vcombine.high %v3586_v20, %v3602_v54  ;;  %4312 = vrot.lane.b32.xlu1 %v4311_v33, %s4555_s8  ;;  %v177_v20 = vld [vmem:[#allocation8 + $0x78] sm:$0xff] }
 0x753   :  { %4307 = vrot.lane.b32.xlu0 %v4306_v35, %s4557_s11  ;;  %4273 = vmatpush3.bf16.msra.mxu0 %v182_v62  ;;  %v185_v16 = vpack.c.bf16 %v177_v20, %v176_v15 }
 0x754   :  { %v3643_v12 = vrot.slane %v3635_v59, %v4725_v57  ;;  %v3650_v10 = vrot.slane %v3636_v17, %v4725_v57  ;;  %v3659_v9 = vrot.slane %v3651_v0, %v4725_v57  ;;  %v3666_v11 = vrot.slane %v3652_v31, %v4725_v57  ;;  %4274 = vmatprep.subr.bf16.mxu0 %v5754_v49 }
 0x756   :  { %v3962_v21 = vcombine.low %v3643_v12, %v3650_v10  ;;  %v3964_v56 = vcombine.high %v3643_v12, %v3650_v10  ;;  %v3966_v39 = vcombine.low %v3659_v9, %v3666_v11  ;;  %v3968_v19 = vcombine.high %v3659_v9, %v3666_v11  ;;  %4317 = vrot.lane.b32.xlu1 %v4316_v1, %s4556_s9 }
 0x757   :  { %4275 = vmatpush3.bf16.msra.mxu0 %v183_v28 }
 0x758   :  { %v3690_v30 = vrot.slane %v3962_v21, %v4721_v44  ;;  %v3706_v7 = vrot.slane %v3964_v56, %v4721_v44  ;;  %v3722_v47 = vrot.slane %v3966_v39, %v4721_v44  ;;  %v3738_v37 = vrot.slane %v3968_v19, %v4721_v44  ;;  %4276 = vmatprep.subr.bf16.mxu0 %v5754_v49 }
 0x759   :  { %v184_v44 = vpack.c.bf16 %v175_v41, %v174_v3 }
 0x75a   :  { %v3755_v55 = vcombine.low %v3690_v30, %v3706_v7  ;;  %v3787_v53 = vcombine.low %v3722_v47, %v3738_v37  ;;  %v3756_v51 = vcombine.high %v3690_v30, %v3706_v7  ;;  %v3788_v40 = vcombine.high %v3722_v47, %v3738_v37  ;;  %v3969_v30 = vld [vmem:[#allocation10] ss:$0 sm:$0xff] }
 0x75b   :  { %4277 = vmatpush3.bf16.msra.mxu0 %v184_v44 }
 0x75c   :  { %v3763_v27 = vrot.slane %v3755_v55, %v4725_v57  ;;  %v3795_v61 = vrot.slane %v3787_v53, %v4725_v57  ;;  %v3770_v38 = vrot.slane %v3756_v51, %v4725_v57  ;;  %v3802_v18 = vrot.slane %v3788_v40, %v4725_v57  ;;  %4278 = vmatprep.subr.bf16.mxu0 %v5754_v49 }
 0x75e   :  { %v3808_v58 = vcombine.high %v3763_v27, %v3795_v61  ;;  %v3807_v4 = vcombine.low %v3763_v27, %v3795_v61  ;;  %v3810_v5 = vcombine.high %v3770_v38, %v3802_v18  ;;  %v3809_v26 = vcombine.low %v3770_v38, %v3802_v18 }
 0x75f   :  { %4279 = vmatpush3.bf16.msra.mxu0 %v185_v16 }
 0x760   :  { %v4326_v45 = vpack.i.bf16 %v2038_v29, %v3808_v58  ;;  %v4321_v23 = vpack.i.bf16 %v2037_v48, %v3807_v4  ;;  %v4331_v57 = vpack.i.bf16 %v2039_v32, %v3809_v26 }
 0x762   :  { %4327 = vrot.lane.b32.xlu1 %v4326_v45, %s4551_s4  ;;  %4322 = vrot.lane.b32.xlu0 %v4321_v23, %s4553_s6 }
 0x766   :  { %3836 = vrot.lane.b32.xlu1 %v3810_v5, %s4552_s30  ;;  %4332 = vrot.lane.b32.xlu0 %v4331_v57, %s4554_s7 }
 0x76a   :  { %2066 = vrot.lane.b32.xlu0 %v2040_v46, %s4552_s30 }
 0x7c4   :  { %v4313_v34 = vpop.permute.xlu1 %4312 }
 0x7c5   :  { %v4308_v52 = vpop.permute.xlu0 %4307  ;;  %v4315_v32 = vunpack.i.h.bf16 %v4313_v34  ;;  %v4314_v14 = vunpack.i.l.bf16 %v4313_v34 }
 0x7c6   :  { %v4310_v29 = vunpack.i.h.bf16 %v4308_v52  ;;  %v4309_v48 = vunpack.i.l.bf16 %v4308_v52 }
 0x7c8   :  { %v4318_v49 = vpop.permute.xlu1 %4317  ;;  %v2069_v54 = vsel %vm934_vm1, %v2033_v42, %v4310_v29  ;;  %v3839_v60 = vsel %vm934_vm1, %v3803_v25, %v4309_v48 }
 0x7c9   :  { %v4320_v50 = vunpack.i.h.bf16 %v4318_v49  ;;  %v4319_v13 = vunpack.i.l.bf16 %v4318_v49  ;;  %v2071_v35 = vsel %vm2070_vm4, %v2069_v54, %v4315_v32  ;;  %v3840_v24 = vsel %vm2070_vm4, %v3839_v60, %v4314_v14 }
 0x7cb   :  { %v2073_v59 = vsel %vm2072_vm5, %v2071_v35, %v4320_v50  ;;  %v3841_v17 = vsel %vm2072_vm5, %v3840_v24, %v4319_v13 }
 0x7d4   :  { %v4328_v46 = vpop.permute.xlu1 %4327  ;;  %v4323_v33 = vpop.permute.xlu0 %4322 }
 0x7d5   :  { %v4325_v22 = vunpack.i.h.bf16 %v4323_v33  ;;  %v4324_v1 = vunpack.i.l.bf16 %v4323_v33  ;;  %v4330_v8 = vunpack.i.h.bf16 %v4328_v46  ;;  %v4329_v63 = vunpack.i.l.bf16 %v4328_v46 }
 0x7d7   :  { %v2075_v42 = vsel %vm2074_vm6, %v2073_v59, %v4325_v22  ;;  %v3842_v0 = vsel %vm2074_vm6, %v3841_v17, %v4324_v1 }
 0x7d8   :  { %v4333_v43 = vpop.permute.xlu0 %4332  ;;  %v3843_v31 = vsel %vm2076_vm7, %v3842_v0, %v4329_v63  ;;  %v2077_v62 = vsel %vm2076_vm7, %v2075_v42, %v4330_v8  ;;  %v3837_v12 = vpop.permute.xlu1 %3836 }
 0x7d9   :  { %v4335_v6 = vunpack.i.h.bf16 %v4333_v43  ;;  %v4334_v25 = vunpack.i.l.bf16 %v4333_v43 }
 0x7db   :  { %v3844_v10 = vsel %vm2078_vm8, %v3843_v31, %v4334_v25  ;;  %v2079_v9 = vsel %vm2078_vm8, %v2077_v62, %v4335_v6 }
 0x7dc   :  { %v2067_v11 = vpop.permute.xlu0 %2066  ;;  %v3845_v21 = vsel %vm2080_vm9, %v3844_v10, %v3837_v12 }
 0x7dd   :  { %v2081_v56 = vsel %vm2080_vm9, %v2079_v9, %v2067_v11  ;;  %v3846_v39 = vpack.c.bf16 %v3845_v21, %v3845_v21 }
 0x7de   :  { %v2082_v19 = vpack.c.bf16 %v2081_v56, %v2081_v56 }
 0x7df   :  { %v3848_v2 = vrot.slane %v3846_v39, 4 }
 0x7e1   :  { %v3851_v36 = vsel %vm1403_vm3, %v2082_v19, %v3848_v2 }
 0x7e2   :  { %4281 = vmatmul.mubr.bf16.vlgmr.msra.gmra.mrb[60].mxu0 %v3851_v36 }
 0x8b5   :  { %v3893_v7 = vpop.f32.mrb[60].mxu0 }
 0x8b6   :  { %v3894_v47 = vadd.f32 %v3969_v30, %v3893_v7  ;;  %v4282_v37 = vpop.f32.mrb[61].mxu0 }
 0x8b7   :  { %v3896_v28 = vpop.f32.mrb[62].mxu0 }
 0x8b8   :  { %3900 = vst [vmem:[#allocation11] sm:$0xff] %v3894_v47  ;;  %v3897_v55 = vadd.f32 %v3969_v30, %v3896_v28  ;;  %v4283_v53 = vpop.f32.mrb[63].mxu0 }
 0x8ba   :  { %3901 = vst [vmem:[#allocation11 + $0x8] sm:$0xff] %v3897_v55 }
 0x8bb   :  { %4521 = shalt.err (!%p4518_p2)
}
 0x8bc   :  { %s4522_s17 = scalar_lea.hbm %s5736_s5, 256 }
 0x8bd   :  { %p4523_p3 = scmp.ne.s32.totalorder %s5736_s5, %s4522_s17  ;;  %p4526_p4 = scmp.lt.u32.totalorder %s4522_s17, %s5736_s5 }
 0x8bf   :  { %p4528_p5 = pnand %p4526_p4, %p4523_p3 }
 0x8c1   :  { %4531 = shalt.err (!%p4528_p5)
}
 0x8c2   :  { %3913 = dma.vmem_to_hbm [thread:$0]  %s3908_s13, 256, %s5736_s5, [#allocation4], %s4545_s18, %s4545_s18, %s4546_s19  }
 0x8c3   :  { %4538 = dma.done.wait [#allocation4], 256  }
 0x8c4   :  { %4539 = vsyncadd [#allocation4], 4294967040 }
 0x8c5   :  { %3917 = vsyncpa [#allocation3], 1 }
 0x8c6   :  { %3918 = vsyncpa [#allocation6], 1 }
 0x8c7   :  { %3919 = vsyncpa [#allocation9], 1 }
 0x8c8   :  { %3920 = vsyncpa [#allocation4], 1 }

</bundles_post_ra>
